<compile_context>
chip_gen: v7x
topology: tpu7x:2x2x1
jax: 0.10.0
libtpu: 0.0.40
codegen_flags: <defaults>
</compile_context>

<pallas_src>
import functools

import numpy as np
import jax
import jax.numpy as jnp
from jax import lax
from jax.experimental import pallas as pl
from jax.experimental.pallas import tpu as pltpu


CONFIG = dict(
    num_mods=6,
    num_preds=16,
    cls_th=2.0,
    cls_ignore=0.2,
    mgn=0.2,
    cls_coef=1.0,
    reg_coef=1.0,
)


def _round_up(x, m):
    return (x + m - 1) // m * m


def _pred_loss_kernel(cls_ref, reg_ref, gt_ref, has_ref, out_ref, *,
                      cls_th, cls_ignore, mgn_th):
    """One lane-tile of actors -> lane-dense per-lane partial sums.

    cls_ref : [M, TN]        f32
    reg_ref : [M, 2, T, TN]  trajectory dtype (bf16 or f32)
    gt_ref  : [2, T, TN]     trajectory dtype
    has_ref : [T, TN]        trajectory dtype, exact 0/1
    out_ref : [1, 8, TN]     f32; rows 0=num_cls 1=sum(masked mgn)
                              2=smoothL1 sum 3=num_reg, 4..7 = 0
    """
    M, TN = cls_ref.shape
    T = has_ref.shape[0]
    bdt = gt_ref.dtype

    cls = cls_ref[...]                                    # [M, TN] f32
    gt = gt_ref[...]                                      # [2, T, TN] traj dtype
    has = has_ref[...].astype(jnp.float32)                # [T, TN] exact 0/1

    # --- last valid timestep per actor (unique argmax: has is 0/1, offsets distinct)
    t_iota = lax.broadcasted_iota(jnp.int32, (T, TN), 0).astype(jnp.float32)
    last = has + (0.1 / float(T)) * t_iota                # [T, TN]
    max_last = jnp.max(last, axis=0, keepdims=True)       # [1, TN]
    last_oh = (last == max_last).astype(bdt)              # [T, TN] 0/1 (traj dtype)
    valid_b = max_last > 1.0                              # [1, TN]; zero-padded lanes invalid
    valid_f = valid_b.astype(jnp.float32)

    # gt endpoint: exact one-hot selection (0/1 multiply is lossless in bf16)
    gt_last = jnp.sum(gt * last_oh[None], axis=1).astype(jnp.float32)   # [2, TN]

    # --- pass 1 over modes: endpoint distances; never materialize the tile in f32
    dist_sq = []
    for m in range(M):
        e = jnp.sum(reg_ref[m] * last_oh[None], axis=1).astype(jnp.float32)  # [2, TN]
        d = e - gt_last
        dist_sq.append(d[0:1] * d[0:1] + d[1:2] * d[1:2])                    # [1, TN]
    dist = jnp.sqrt(jnp.concatenate(dist_sq, axis=0))     # [M, TN] f32

    # first-minimum argmin over modes (matches torch / numpy argmin convention)
    min_dist = jnp.min(dist, axis=0, keepdims=True)       # [1, TN]
    m_iota = lax.broadcasted_iota(jnp.int32, (M, TN), 0).astype(jnp.float32)
    min_idx = jnp.min(jnp.where(dist == min_dist, m_iota, float(M)),
                      axis=0, keepdims=True)              # [1, TN]
    min_oh = m_iota == min_idx                            # [M, TN] bool

    # --- classification (max-margin) per-lane partials
    cls_min = jnp.sum(jnp.where(min_oh, cls, 0.0), axis=0, keepdims=True)    # [1, TN]
    mgn = cls_min - cls                                    # [M, TN]
    msk = (valid_b & (min_dist < cls_th)
           & ((dist - min_dist) > cls_ignore) & (mgn < mgn_th))              # [M, TN]
    num_cls_l = jnp.sum(msk.astype(jnp.float32), axis=0, keepdims=True)      # [1, TN]
    mgn_sum_l = jnp.sum(jnp.where(msk, mgn, 0.0), axis=0, keepdims=True)     # [1, TN]

    # --- pass 2 over modes: select best mode's trajectory (exact bf16 selection)
    min_oh_t = min_oh.astype(bdt)                          # [M, TN]
    reg_sel = reg_ref[0] * min_oh_t[0:1][None]             # [2, T, TN] traj dtype
    for m in range(1, M):
        reg_sel = reg_sel + reg_ref[m] * min_oh_t[m:m + 1][None]

    # smooth-L1 on the selected mode, accumulated per coordinate (small f32 live set)
    w = has * valid_f                                      # [T, TN] exact 0/1
    wmask = w > 0.5                                        # [T, TN] bool
    reg_loss_l = jnp.zeros((1, TN), jnp.float32)
    for c in range(2):
        dd = reg_sel[c].astype(jnp.float32) - gt[c].astype(jnp.float32)      # [T, TN]
        a = jnp.abs(dd)
        sl1 = jnp.where(a < 1.0, (0.5 * dd) * dd, a - 0.5)
        reg_loss_l = reg_loss_l + jnp.sum(jnp.where(wmask, sl1, 0.0),
                                          axis=0, keepdims=True)
    num_reg_l = jnp.sum(w, axis=0, keepdims=True)          # [1, TN]

    # single merged, lane-dense output block (counts are small exact ints in f32)
    out_ref[...] = jnp.zeros_like(out_ref)
    out_ref[0, 0:1, :] = num_cls_l
    out_ref[0, 1:2, :] = mgn_sum_l
    out_ref[0, 2:3, :] = reg_loss_l
    out_ref[0, 3:4, :] = num_reg_l


def make_pred_loss(config, *, use_bf16=True, max_tile_n=2048):
    """Returns a jitted fn(cls[N,M], reg[N,M,T,2], gt[N,T,2], has[N,T]) -> dict.

    use_bf16=True halves HBM traffic of the trajectory tensors (selection math
    is exact; reductions run in f32); set False for f32 input semantics.
    """
    cls_th = float(config['cls_th'])
    cls_ignore = float(config['cls_ignore'])
    mgn_th = float(config['mgn'])
    cls_coef = float(config['cls_coef'])
    reg_coef = float(config['reg_coef'])
    traj_dtype = jnp.bfloat16 if use_bf16 else jnp.float32
    max_tile_n = max(128, _round_up(int(max_tile_n), 128))

    def loss_fn(cls, reg, gt_preds, has_preds):
        N, M = cls.shape
        T = reg.shape[2]

        # One transpose+cast per tensor (fused under jit): actors -> lanes, modes lead.
        # TODO(synk): if this loss is hot (esp. v5e), have the upstream producer emit
        # the actors-last / bf16 layout directly; the transpose re-reads reg from HBM.
        cls_t = jnp.transpose(cls.astype(jnp.float32), (1, 0))          # [M, N]
        reg_t = jnp.transpose(reg.astype(traj_dtype), (1, 3, 2, 0))     # [M, 2, T, N]
        gt_t = jnp.transpose(gt_preds.astype(traj_dtype), (2, 1, 0))    # [2, T, N]
        has_t = jnp.transpose(has_preds.astype(traj_dtype), (1, 0))     # [T, N] 0/1

        # Tile choice: as large as possible (amortize ~0.35us/step overhead, cap at
        # max_tile_n) but >= 2 tiles whenever N > 128 so v7x feeds both TensorCores.
        tn = max(128, min(max_tile_n, _round_up((N + 1) // 2, 128)))
        num_tiles = pl.cdiv(N, tn)
        n_pad = num_tiles * tn
        if n_pad != N:   # zero padding => has == 0 => lane invalid inside the kernel
            pw = n_pad - N
            cls_t = jnp.pad(cls_t, ((0, 0), (0, pw)))
            reg_t = jnp.pad(reg_t, ((0, 0), (0, 0), (0, 0), (0, pw)))
            gt_t = jnp.pad(gt_t, ((0, 0), (0, 0), (0, pw)))
            has_t = jnp.pad(has_t, ((0, 0), (0, pw)))

        kernel = functools.partial(_pred_loss_kernel, cls_th=cls_th,
                                   cls_ignore=cls_ignore, mgn_th=mgn_th)

        grid_spec = pltpu.PrefetchScalarGridSpec(
            num_scalar_prefetch=0,
            grid=(num_tiles,),
            in_specs=[
                pl.BlockSpec((M, tn), lambda i: (0, i)),
                pl.BlockSpec((M, 2, T, tn), lambda i: (0, 0, 0, i)),
                pl.BlockSpec((2, T, tn), lambda i: (0, 0, i)),
                pl.BlockSpec((T, tn), lambda i: (0, i)),
            ],
            out_specs=pl.BlockSpec((1, 8, tn), lambda i: (i, 0, 0)),
        )

        partials = pl.pallas_call(
            kernel,
            out_shape=jax.ShapeDtypeStruct((num_tiles, 8, tn), jnp.float32),
            grid_spec=grid_spec,
            compiler_params=pltpu.CompilerParams(
                dimension_semantics=("parallel",)),
        )(cls_t, reg_t, gt_t, has_t)

        # Tiny epilogue: sum lane-dense partials over tiles+lanes.  Per-lane counts
        # are tiny exact integers in f32, so casting before the sum keeps counts
        # exactly in int32 regardless of batch size.
        num_cls = jnp.sum(partials[:, 0, :].astype(jnp.int32))
        mgn_sum = jnp.sum(partials[:, 1, :])
        reg_loss = reg_coef * jnp.sum(partials[:, 2, :])
        num_reg = jnp.sum(partials[:, 3, :].astype(jnp.int32))
        cls_loss = cls_coef * (mgn_th * num_cls.astype(jnp.float32) - mgn_sum)
        return dict(cls_loss=cls_loss, num_cls=num_cls,
                    reg_loss=reg_loss, num_reg=num_reg)

    return jax.jit(loss_fn)


def pred_loss_reference(cls, reg, gt_preds, has_preds, config):
    """Direct numpy transcription of the PyTorch forward (for verification)."""
    cls = np.asarray(cls, dtype=np.float32)
    reg = np.asarray(reg, dtype=np.float32)
    gt = np.asarray(gt_preds, dtype=np.float32)
    has = np.asarray(has_preds, dtype=bool)
    num_mods, num_preds = config['num_mods'], config['num_preds']

    last = has.astype(np.float32) + 0.1 * np.arange(num_preds, dtype=np.float32) / float(num_preds)
    last_idcs = last.argmax(1)
    max_last = last.max(1)
    mask = max_last > 1.0
    cls, reg, gt, has, last_idcs = cls[mask], reg[mask], gt[mask], has[mask], last_idcs[mask]

    row = np.arange(len(last_idcs))
    dist = np.stack(
        [np.sqrt(((reg[row, j, last_idcs] - gt[row, last_idcs]) ** 2).sum(1))
         for j in range(num_mods)], axis=1)
    min_idcs = dist.argmin(1)
    min_dist = dist.min(1)
    row = np.arange(len(min_idcs))

    mgn = cls[row, min_idcs][:, None] - cls
    mask0 = (min_dist < config['cls_th'])[:, None]
    mask1 = dist - min_dist[:, None] > config['cls_ignore']
    mgn = mgn[mask0 & mask1]
    msk = mgn < config['mgn']
    cls_loss = config['cls_coef'] * (config['mgn'] * msk.sum() - mgn[msk].sum())
    num_cls = int(msk.sum())

    reg_sel = reg[row, min_idcs]
    d = reg_sel[has] - gt[has]
    a = np.abs(d)
    reg_loss = config['reg_coef'] * np.where(a < 1.0, 0.5 * d * d, a - 0.5).sum()
    num_reg = int(has.sum())

    return dict(cls_loss=np.float32(cls_loss), num_cls=num_cls,
                reg_loss=np.float32(reg_loss), num_reg=num_reg)


if __name__ == "__main__":
    M = CONFIG['num_mods']
    T = CONFIG['num_preds']
    actors_per_scene = [70, 70]        # the module concatenates per-scene lists
    N = sum(actors_per_scene)

    key = jax.random.PRNGKey(0)
    k1, k2, k3, k4 = jax.random.split(key, 4)
    cls_all = jax.random.normal(k1, (N, M), dtype=jnp.float32)
    reg_all = 3.0 * jax.random.normal(k2, (N, M, T, 2), dtype=jnp.float32)
    gt_all = 3.0 * jax.random.normal(k3, (N, T, 2), dtype=jnp.float32)
    has_all = jax.random.uniform(k4, (N, T)) > 0.3
    # exercise the `max_last > 1.0` filtering edge cases:
    has_all = has_all.at[0].set(False)                       # no valid steps
    has_all = has_all.at[1].set(False).at[1, 0].set(True)    # only t=0 valid (filtered)

    # mimic the list-of-tensors interface: split per scene, then concat (glue, plain JAX)
    splits = np.cumsum(actors_per_scene)[:-1].tolist()
    cls_list = jnp.split(cls_all, splits, axis=0)
    reg_list = jnp.split(reg_all, splits, axis=0)
    gt_list = jnp.split(gt_all, splits, axis=0)
    has_list = jnp.split(has_all, splits, axis=0)

    cls_cat = jnp.concatenate(cls_list, axis=0)
    reg_cat = jnp.concatenate(reg_list, axis=0)
    gt_cat = jnp.concatenate(gt_list, axis=0)
    has_cat = jnp.concatenate(has_list, axis=0)

    # TODO(synk): the `zero = 0.0*(cls.sum()+reg.sum())` autograd-anchoring term is
    # numerically zero and has no forward-value effect; it is intentionally omitted.
    loss_fn = make_pred_loss(CONFIG, use_bf16=True)   # default tiling (>=2 tiles here)
    out = loss_fn(cls_cat, reg_cat, gt_cat, has_cat)
    out = jax.tree_util.tree_map(jax.block_until_ready, out)

    # reference computed on the same bf16-rounded trajectories the kernel DMAs.
    reg_in = np.asarray(reg_cat.astype(jnp.bfloat16).astype(jnp.float32))
    gt_in = np.asarray(gt_cat.astype(jnp.bfloat16).astype(jnp.float32))
    ref = pred_loss_reference(np.asarray(cls_cat), reg_in, gt_in,
                              np.asarray(has_cat), CONFIG)

    assert int(out['num_cls']) == ref['num_cls'], (int(out['num_cls']), ref['num_cls'])
    assert int(out['num_reg']) == ref['num_reg'], (int(out['num_reg']), ref['num_reg'])
    np.testing.assert_allclose(np.float32(out['cls_loss']), ref['cls_loss'],
                               rtol=1e-4, atol=1e-4)
    np.testing.assert_allclose(np.float32(out['reg_loss']), ref['reg_loss'],
                               rtol=1e-4, atol=1e-4)

    print("KERNEL_OK")
</pallas_src>

<mosaic_0001>
module attributes {stable_mosaic.version = 11 : i64} {
  func.func @_pred_loss_kernel(%arg0: i32, %arg1: memref<6x128xf32, #tpu.memory_space<vmem>>, %arg2: memref<6x2x16x128xbf16, #tpu.memory_space<vmem>>, %arg3: memref<2x16x128xbf16, #tpu.memory_space<vmem>>, %arg4: memref<16x128xbf16, #tpu.memory_space<vmem>>, %arg5: memref<1x8x128xf32, #tpu.memory_space<vmem>>) attributes {dimension_semantics = [#tpu.dimension_semantics<parallel>], iteration_bounds = array<i64: 2>, scalar_prefetch = 0 : i64, scratch_operands = 0 : i64, tpu.core_type = #tpu.core_type<tc>, window_params = [{transform_indices = @transform_0, window_bounds = array<i64: 6, 128>}, {transform_indices = @transform_1, window_bounds = array<i64: 6, 2, 16, 128>}, {transform_indices = @transform_2, window_bounds = array<i64: 2, 16, 128>}, {transform_indices = @transform_3, window_bounds = array<i64: 16, 128>}, {transform_indices = @transform_4, window_bounds = array<i64: 1, 8, 128>}]} {
    %c0 = arith.constant 0 : index
    %c0_0 = arith.constant 0 : index
    %0 = vector.load %arg1[%c0, %c0_0] : memref<6x128xf32, #tpu.memory_space<vmem>>, vector<6x128xf32>
    %c0_1 = arith.constant 0 : index
    %c0_2 = arith.constant 0 : index
    %c0_3 = arith.constant 0 : index
    %1 = vector.load %arg3[%c0_1, %c0_2, %c0_3] : memref<2x16x128xbf16, #tpu.memory_space<vmem>>, vector<2x16x128xbf16>
    %c0_4 = arith.constant 0 : index
    %c0_5 = arith.constant 0 : index
    %2 = vector.load %arg4[%c0_4, %c0_5] : memref<16x128xbf16, #tpu.memory_space<vmem>>, vector<16x128xbf16>
    %3 = arith.extf %2 : vector<16x128xbf16> to vector<16x128xf32>
    %4 = tpu.iota {dimensions = array<i32: 0>} : vector<16x128xi32>
    %5 = arith.sitofp %4 : vector<16x128xi32> to vector<16x128xf32>
    %cst = arith.constant 6.250000e-03 : f32
    %6 = vector.broadcast %cst : f32 to vector<16x128xf32>
    %7 = arith.mulf %6, %5 : vector<16x128xf32>
    %8 = arith.addf %3, %7 : vector<16x128xf32>
    %cst_6 = arith.constant dense<0xFF800000> : vector<128xf32>
    %9 = vector.multi_reduction <maximumf>, %8, %cst_6 [0] : vector<16x128xf32> to vector<128xf32>
    %10 = vector.shape_cast %9 : vector<128xf32> to vector<1x128xf32>
    %11 = vector.broadcast %10 : vector<1x128xf32> to vector<16x128xf32>
    %12 = arith.cmpf oeq, %8, %11 : vector<16x128xf32>
    %13 = arith.extui %12 : vector<16x128xi1> to vector<16x128xi32>
    %14 = arith.sitofp %13 : vector<16x128xi32> to vector<16x128xf32>
    %15 = arith.truncf %14 : vector<16x128xf32> to vector<16x128xbf16>
    %cst_7 = arith.constant 1.000000e+00 : f32
    %16 = vector.broadcast %cst_7 : f32 to vector<1x128xf32>
    %17 = arith.cmpf ogt, %10, %16 : vector<1x128xf32>
    %18 = arith.extui %17 : vector<1x128xi1> to vector<1x128xi32>
    %19 = arith.sitofp %18 : vector<1x128xi32> to vector<1x128xf32>
    %20 = vector.shape_cast %15 : vector<16x128xbf16> to vector<1x16x128xbf16>
    %21 = vector.broadcast %20 : vector<1x16x128xbf16> to vector<2x16x128xbf16>
    %22 = arith.mulf %1, %21 : vector<2x16x128xbf16>
    %23 = arith.extf %22 : vector<2x16x128xbf16> to vector<2x16x128xf32>
    %cst_8 = arith.constant dense<0.000000e+00> : vector<2x128xf32>
    %24 = vector.multi_reduction <add>, %23, %cst_8 [1] : vector<2x16x128xf32> to vector<2x128xf32>
    %25 = arith.truncf %24 : vector<2x128xf32> to vector<2x128xbf16>
    %26 = arith.extf %25 : vector<2x128xbf16> to vector<2x128xf32>
    %c0_9 = arith.constant 0 : index
    %c0_10 = arith.constant 0 : index
    %c0_11 = arith.constant 0 : index
    %c0_12 = arith.constant 0 : index
    %27 = vector.load %arg2[%c0_9, %c0_10, %c0_11, %c0_12] : memref<6x2x16x128xbf16, #tpu.memory_space<vmem>>, vector<1x2x16x128xbf16>
    %28 = vector.shape_cast %27 : vector<1x2x16x128xbf16> to vector<2x16x128xbf16>
    %29 = vector.shape_cast %15 : vector<16x128xbf16> to vector<1x16x128xbf16>
    %30 = vector.broadcast %29 : vector<1x16x128xbf16> to vector<2x16x128xbf16>
    %31 = arith.mulf %28, %30 : vector<2x16x128xbf16>
    %32 = arith.extf %31 : vector<2x16x128xbf16> to vector<2x16x128xf32>
    %cst_13 = arith.constant dense<0.000000e+00> : vector<2x128xf32>
    %33 = vector.multi_reduction <add>, %32, %cst_13 [1] : vector<2x16x128xf32> to vector<2x128xf32>
    %34 = arith.truncf %33 : vector<2x128xf32> to vector<2x128xbf16>
    %35 = arith.extf %34 : vector<2x128xbf16> to vector<2x128xf32>
    %36 = arith.subf %35, %26 : vector<2x128xf32>
    %37 = vector.extract_strided_slice %36 {offsets = [0, 0], sizes = [1, 128], strides = [1, 1]} : vector<2x128xf32> to vector<1x128xf32>
    %38 = vector.extract_strided_slice %36 {offsets = [0, 0], sizes = [1, 128], strides = [1, 1]} : vector<2x128xf32> to vector<1x128xf32>
    %39 = arith.mulf %37, %38 : vector<1x128xf32>
    %40 = vector.extract_strided_slice %36 {offsets = [1, 0], sizes = [1, 128], strides = [1, 1]} : vector<2x128xf32> to vector<1x128xf32>
    %41 = vector.extract_strided_slice %36 {offsets = [1, 0], sizes = [1, 128], strides = [1, 1]} : vector<2x128xf32> to vector<1x128xf32>
    %42 = arith.mulf %40, %41 : vector<1x128xf32>
    %43 = arith.addf %39, %42 : vector<1x128xf32>
    %c1 = arith.constant 1 : index
    %c0_14 = arith.constant 0 : index
    %c0_15 = arith.constant 0 : index
    %c0_16 = arith.constant 0 : index
    %44 = vector.load %arg2[%c1, %c0_14, %c0_15, %c0_16] : memref<6x2x16x128xbf16, #tpu.memory_space<vmem>>, vector<1x2x16x128xbf16>
    %45 = vector.shape_cast %44 : vector<1x2x16x128xbf16> to vector<2x16x128xbf16>
    %46 = vector.shape_cast %15 : vector<16x128xbf16> to vector<1x16x128xbf16>
    %47 = vector.broadcast %46 : vector<1x16x128xbf16> to vector<2x16x128xbf16>
    %48 = arith.mulf %45, %47 : vector<2x16x128xbf16>
    %49 = arith.extf %48 : vector<2x16x128xbf16> to vector<2x16x128xf32>
    %cst_17 = arith.constant dense<0.000000e+00> : vector<2x128xf32>
    %50 = vector.multi_reduction <add>, %49, %cst_17 [1] : vector<2x16x128xf32> to vector<2x128xf32>
    %51 = arith.truncf %50 : vector<2x128xf32> to vector<2x128xbf16>
    %52 = arith.extf %51 : vector<2x128xbf16> to vector<2x128xf32>
    %53 = arith.subf %52, %26 : vector<2x128xf32>
    %54 = vector.extract_strided_slice %53 {offsets = [0, 0], sizes = [1, 128], strides = [1, 1]} : vector<2x128xf32> to vector<1x128xf32>
    %55 = vector.extract_strided_slice %53 {offsets = [0, 0], sizes = [1, 128], strides = [1, 1]} : vector<2x128xf32> to vector<1x128xf32>
    %56 = arith.mulf %54, %55 : vector<1x128xf32>
    %57 = vector.extract_strided_slice %53 {offsets = [1, 0], sizes = [1, 128], strides = [1, 1]} : vector<2x128xf32> to vector<1x128xf32>
    %58 = vector.extract_strided_slice %53 {offsets = [1, 0], sizes = [1, 128], strides = [1, 1]} : vector<2x128xf32> to vector<1x128xf32>
    %59 = arith.mulf %57, %58 : vector<1x128xf32>
    %60 = arith.addf %56, %59 : vector<1x128xf32>
    %c2 = arith.constant 2 : index
    %c0_18 = arith.constant 0 : index
    %c0_19 = arith.constant 0 : index
    %c0_20 = arith.constant 0 : index
    %61 = vector.load %arg2[%c2, %c0_18, %c0_19, %c0_20] : memref<6x2x16x128xbf16, #tpu.memory_space<vmem>>, vector<1x2x16x128xbf16>
    %62 = vector.shape_cast %61 : vector<1x2x16x128xbf16> to vector<2x16x128xbf16>
    %63 = vector.shape_cast %15 : vector<16x128xbf16> to vector<1x16x128xbf16>
    %64 = vector.broadcast %63 : vector<1x16x128xbf16> to vector<2x16x128xbf16>
    %65 = arith.mulf %62, %64 : vector<2x16x128xbf16>
    %66 = arith.extf %65 : vector<2x16x128xbf16> to vector<2x16x128xf32>
    %cst_21 = arith.constant dense<0.000000e+00> : vector<2x128xf32>
    %67 = vector.multi_reduction <add>, %66, %cst_21 [1] : vector<2x16x128xf32> to vector<2x128xf32>
    %68 = arith.truncf %67 : vector<2x128xf32> to vector<2x128xbf16>
    %69 = arith.extf %68 : vector<2x128xbf16> to vector<2x128xf32>
    %70 = arith.subf %69, %26 : vector<2x128xf32>
    %71 = vector.extract_strided_slice %70 {offsets = [0, 0], sizes = [1, 128], strides = [1, 1]} : vector<2x128xf32> to vector<1x128xf32>
    %72 = vector.extract_strided_slice %70 {offsets = [0, 0], sizes = [1, 128], strides = [1, 1]} : vector<2x128xf32> to vector<1x128xf32>
    %73 = arith.mulf %71, %72 : vector<1x128xf32>
    %74 = vector.extract_strided_slice %70 {offsets = [1, 0], sizes = [1, 128], strides = [1, 1]} : vector<2x128xf32> to vector<1x128xf32>
    %75 = vector.extract_strided_slice %70 {offsets = [1, 0], sizes = [1, 128], strides = [1, 1]} : vector<2x128xf32> to vector<1x128xf32>
    %76 = arith.mulf %74, %75 : vector<1x128xf32>
    %77 = arith.addf %73, %76 : vector<1x128xf32>
    %c3 = arith.constant 3 : index
    %c0_22 = arith.constant 0 : index
    %c0_23 = arith.constant 0 : index
    %c0_24 = arith.constant 0 : index
    %78 = vector.load %arg2[%c3, %c0_22, %c0_23, %c0_24] : memref<6x2x16x128xbf16, #tpu.memory_space<vmem>>, vector<1x2x16x128xbf16>
    %79 = vector.shape_cast %78 : vector<1x2x16x128xbf16> to vector<2x16x128xbf16>
    %80 = vector.shape_cast %15 : vector<16x128xbf16> to vector<1x16x128xbf16>
    %81 = vector.broadcast %80 : vector<1x16x128xbf16> to vector<2x16x128xbf16>
    %82 = arith.mulf %79, %81 : vector<2x16x128xbf16>
    %83 = arith.extf %82 : vector<2x16x128xbf16> to vector<2x16x128xf32>
    %cst_25 = arith.constant dense<0.000000e+00> : vector<2x128xf32>
    %84 = vector.multi_reduction <add>, %83, %cst_25 [1] : vector<2x16x128xf32> to vector<2x128xf32>
    %85 = arith.truncf %84 : vector<2x128xf32> to vector<2x128xbf16>
    %86 = arith.extf %85 : vector<2x128xbf16> to vector<2x128xf32>
    %87 = arith.subf %86, %26 : vector<2x128xf32>
    %88 = vector.extract_strided_slice %87 {offsets = [0, 0], sizes = [1, 128], strides = [1, 1]} : vector<2x128xf32> to vector<1x128xf32>
    %89 = vector.extract_strided_slice %87 {offsets = [0, 0], sizes = [1, 128], strides = [1, 1]} : vector<2x128xf32> to vector<1x128xf32>
    %90 = arith.mulf %88, %89 : vector<1x128xf32>
    %91 = vector.extract_strided_slice %87 {offsets = [1, 0], sizes = [1, 128], strides = [1, 1]} : vector<2x128xf32> to vector<1x128xf32>
    %92 = vector.extract_strided_slice %87 {offsets = [1, 0], sizes = [1, 128], strides = [1, 1]} : vector<2x128xf32> to vector<1x128xf32>
    %93 = arith.mulf %91, %92 : vector<1x128xf32>
    %94 = arith.addf %90, %93 : vector<1x128xf32>
    %c4 = arith.constant 4 : index
    %c0_26 = arith.constant 0 : index
    %c0_27 = arith.constant 0 : index
    %c0_28 = arith.constant 0 : index
    %95 = vector.load %arg2[%c4, %c0_26, %c0_27, %c0_28] : memref<6x2x16x128xbf16, #tpu.memory_space<vmem>>, vector<1x2x16x128xbf16>
    %96 = vector.shape_cast %95 : vector<1x2x16x128xbf16> to vector<2x16x128xbf16>
    %97 = vector.shape_cast %15 : vector<16x128xbf16> to vector<1x16x128xbf16>
    %98 = vector.broadcast %97 : vector<1x16x128xbf16> to vector<2x16x128xbf16>
    %99 = arith.mulf %96, %98 : vector<2x16x128xbf16>
    %100 = arith.extf %99 : vector<2x16x128xbf16> to vector<2x16x128xf32>
    %cst_29 = arith.constant dense<0.000000e+00> : vector<2x128xf32>
    %101 = vector.multi_reduction <add>, %100, %cst_29 [1] : vector<2x16x128xf32> to vector<2x128xf32>
    %102 = arith.truncf %101 : vector<2x128xf32> to vector<2x128xbf16>
    %103 = arith.extf %102 : vector<2x128xbf16> to vector<2x128xf32>
    %104 = arith.subf %103, %26 : vector<2x128xf32>
    %105 = vector.extract_strided_slice %104 {offsets = [0, 0], sizes = [1, 128], strides = [1, 1]} : vector<2x128xf32> to vector<1x128xf32>
    %106 = vector.extract_strided_slice %104 {offsets = [0, 0], sizes = [1, 128], strides = [1, 1]} : vector<2x128xf32> to vector<1x128xf32>
    %107 = arith.mulf %105, %106 : vector<1x128xf32>
    %108 = vector.extract_strided_slice %104 {offsets = [1, 0], sizes = [1, 128], strides = [1, 1]} : vector<2x128xf32> to vector<1x128xf32>
    %109 = vector.extract_strided_slice %104 {offsets = [1, 0], sizes = [1, 128], strides = [1, 1]} : vector<2x128xf32> to vector<1x128xf32>
    %110 = arith.mulf %108, %109 : vector<1x128xf32>
    %111 = arith.addf %107, %110 : vector<1x128xf32>
    %c5 = arith.constant 5 : index
    %c0_30 = arith.constant 0 : index
    %c0_31 = arith.constant 0 : index
    %c0_32 = arith.constant 0 : index
    %112 = vector.load %arg2[%c5, %c0_30, %c0_31, %c0_32] : memref<6x2x16x128xbf16, #tpu.memory_space<vmem>>, vector<1x2x16x128xbf16>
    %113 = vector.shape_cast %112 : vector<1x2x16x128xbf16> to vector<2x16x128xbf16>
    %114 = vector.shape_cast %15 : vector<16x128xbf16> to vector<1x16x128xbf16>
    %115 = vector.broadcast %114 : vector<1x16x128xbf16> to vector<2x16x128xbf16>
    %116 = arith.mulf %113, %115 : vector<2x16x128xbf16>
    %117 = arith.extf %116 : vector<2x16x128xbf16> to vector<2x16x128xf32>
    %cst_33 = arith.constant dense<0.000000e+00> : vector<2x128xf32>
    %118 = vector.multi_reduction <add>, %117, %cst_33 [1] : vector<2x16x128xf32> to vector<2x128xf32>
    %119 = arith.truncf %118 : vector<2x128xf32> to vector<2x128xbf16>
    %120 = arith.extf %119 : vector<2x128xbf16> to vector<2x128xf32>
    %121 = arith.subf %120, %26 : vector<2x128xf32>
    %122 = vector.extract_strided_slice %121 {offsets = [0, 0], sizes = [1, 128], strides = [1, 1]} : vector<2x128xf32> to vector<1x128xf32>
    %123 = vector.extract_strided_slice %121 {offsets = [0, 0], sizes = [1, 128], strides = [1, 1]} : vector<2x128xf32> to vector<1x128xf32>
    %124 = arith.mulf %122, %123 : vector<1x128xf32>
    %125 = vector.extract_strided_slice %121 {offsets = [1, 0], sizes = [1, 128], strides = [1, 1]} : vector<2x128xf32> to vector<1x128xf32>
    %126 = vector.extract_strided_slice %121 {offsets = [1, 0], sizes = [1, 128], strides = [1, 1]} : vector<2x128xf32> to vector<1x128xf32>
    %127 = arith.mulf %125, %126 : vector<1x128xf32>
    %128 = arith.addf %124, %127 : vector<1x128xf32>
    %129 = tpu.concatenate %43, %60, %77, %94, %111, %128 in 0 : vector<1x128xf32>, vector<1x128xf32>, vector<1x128xf32>, vector<1x128xf32>, vector<1x128xf32>, vector<1x128xf32> -> vector<6x128xf32>
    %130 = math.sqrt %129 : vector<6x128xf32>
    %cst_34 = arith.constant dense<0x7F800000> : vector<128xf32>
    %131 = vector.multi_reduction <minimumf>, %130, %cst_34 [0] : vector<6x128xf32> to vector<128xf32>
    %132 = vector.shape_cast %131 : vector<128xf32> to vector<1x128xf32>
    %133 = tpu.iota {dimensions = array<i32: 0>} : vector<6x128xi32>
    %134 = arith.sitofp %133 : vector<6x128xi32> to vector<6x128xf32>
    %135 = vector.broadcast %132 : vector<1x128xf32> to vector<6x128xf32>
    %136 = arith.cmpf oeq, %130, %135 : vector<6x128xf32>
    %cst_35 = arith.constant 6.000000e+00 : f32
    %137 = vector.broadcast %cst_35 : f32 to vector<6x128xf32>
    %138 = arith.select %136, %134, %137 : vector<6x128xi1>, vector<6x128xf32>
    %cst_36 = arith.constant dense<0x7F800000> : vector<128xf32>
    %139 = vector.multi_reduction <minimumf>, %138, %cst_36 [0] : vector<6x128xf32> to vector<128xf32>
    %140 = vector.shape_cast %139 : vector<128xf32> to vector<1x128xf32>
    %141 = vector.broadcast %140 : vector<1x128xf32> to vector<6x128xf32>
    %142 = arith.cmpf oeq, %134, %141 : vector<6x128xf32>
    %cst_37 = arith.constant 0.000000e+00 : f32
    %143 = vector.broadcast %cst_37 : f32 to vector<6x128xf32>
    %144 = arith.select %142, %0, %143 : vector<6x128xi1>, vector<6x128xf32>
    %cst_38 = arith.constant dense<0.000000e+00> : vector<128xf32>
    %145 = vector.multi_reduction <add>, %144, %cst_38 [0] : vector<6x128xf32> to vector<128xf32>
    %146 = vector.shape_cast %145 : vector<128xf32> to vector<1x128xf32>
    %147 = vector.broadcast %146 : vector<1x128xf32> to vector<6x128xf32>
    %148 = arith.subf %147, %0 : vector<6x128xf32>
    %cst_39 = arith.constant 2.000000e+00 : f32
    %149 = vector.broadcast %cst_39 : f32 to vector<1x128xf32>
    %150 = arith.cmpf olt, %132, %149 : vector<1x128xf32>
    %151 = arith.andi %17, %150 : vector<1x128xi1>
    %152 = vector.broadcast %132 : vector<1x128xf32> to vector<6x128xf32>
    %153 = arith.subf %130, %152 : vector<6x128xf32>
    %cst_40 = arith.constant 2.000000e-01 : f32
    %154 = vector.broadcast %cst_40 : f32 to vector<6x128xf32>
    %155 = arith.cmpf ogt, %153, %154 : vector<6x128xf32>
    %156 = vector.broadcast %151 : vector<1x128xi1> to vector<6x128xi1>
    %157 = arith.andi %156, %155 : vector<6x128xi1>
    %cst_41 = arith.constant 2.000000e-01 : f32
    %158 = vector.broadcast %cst_41 : f32 to vector<6x128xf32>
    %159 = arith.cmpf olt, %148, %158 : vector<6x128xf32>
    %160 = arith.andi %157, %159 : vector<6x128xi1>
    %161 = arith.extui %160 : vector<6x128xi1> to vector<6x128xi32>
    %162 = arith.sitofp %161 : vector<6x128xi32> to vector<6x128xf32>
    %cst_42 = arith.constant dense<0.000000e+00> : vector<128xf32>
    %163 = vector.multi_reduction <add>, %162, %cst_42 [0] : vector<6x128xf32> to vector<128xf32>
    %164 = vector.shape_cast %163 : vector<128xf32> to vector<1x128xf32>
    %cst_43 = arith.constant 0.000000e+00 : f32
    %165 = vector.broadcast %cst_43 : f32 to vector<6x128xf32>
    %166 = arith.select %160, %148, %165 : vector<6x128xi1>, vector<6x128xf32>
    %cst_44 = arith.constant dense<0.000000e+00> : vector<128xf32>
    %167 = vector.multi_reduction <add>, %166, %cst_44 [0] : vector<6x128xf32> to vector<128xf32>
    %168 = vector.shape_cast %167 : vector<128xf32> to vector<1x128xf32>
    %169 = arith.extui %142 : vector<6x128xi1> to vector<6x128xi32>
    %170 = arith.sitofp %169 : vector<6x128xi32> to vector<6x128xf32>
    %171 = arith.truncf %170 : vector<6x128xf32> to vector<6x128xbf16>
    %c0_45 = arith.constant 0 : index
    %c0_46 = arith.constant 0 : index
    %c0_47 = arith.constant 0 : index
    %c0_48 = arith.constant 0 : index
    %172 = vector.load %arg2[%c0_45, %c0_46, %c0_47, %c0_48] : memref<6x2x16x128xbf16, #tpu.memory_space<vmem>>, vector<1x2x16x128xbf16>
    %173 = vector.shape_cast %172 : vector<1x2x16x128xbf16> to vector<2x16x128xbf16>
    %174 = vector.extract_strided_slice %171 {offsets = [0, 0], sizes = [1, 128], strides = [1, 1]} : vector<6x128xbf16> to vector<1x128xbf16>
    %175 = vector.shape_cast %174 : vector<1x128xbf16> to vector<1x1x128xbf16>
    %176 = vector.broadcast %175 : vector<1x1x128xbf16> to vector<2x16x128xbf16>
    %177 = arith.mulf %173, %176 : vector<2x16x128xbf16>
    %c1_49 = arith.constant 1 : index
    %c0_50 = arith.constant 0 : index
    %c0_51 = arith.constant 0 : index
    %c0_52 = arith.constant 0 : index
    %178 = vector.load %arg2[%c1_49, %c0_50, %c0_51, %c0_52] : memref<6x2x16x128xbf16, #tpu.memory_space<vmem>>, vector<1x2x16x128xbf16>
    %179 = vector.shape_cast %178 : vector<1x2x16x128xbf16> to vector<2x16x128xbf16>
    %180 = vector.extract_strided_slice %171 {offsets = [1, 0], sizes = [1, 128], strides = [1, 1]} : vector<6x128xbf16> to vector<1x128xbf16>
    %181 = vector.shape_cast %180 : vector<1x128xbf16> to vector<1x1x128xbf16>
    %182 = vector.broadcast %181 : vector<1x1x128xbf16> to vector<2x16x128xbf16>
    %183 = arith.mulf %179, %182 : vector<2x16x128xbf16>
    %184 = arith.addf %177, %183 : vector<2x16x128xbf16>
    %c2_53 = arith.constant 2 : index
    %c0_54 = arith.constant 0 : index
    %c0_55 = arith.constant 0 : index
    %c0_56 = arith.constant 0 : index
    %185 = vector.load %arg2[%c2_53, %c0_54, %c0_55, %c0_56] : memref<6x2x16x128xbf16, #tpu.memory_space<vmem>>, vector<1x2x16x128xbf16>
    %186 = vector.shape_cast %185 : vector<1x2x16x128xbf16> to vector<2x16x128xbf16>
    %187 = vector.extract_strided_slice %171 {offsets = [2, 0], sizes = [1, 128], strides = [1, 1]} : vector<6x128xbf16> to vector<1x128xbf16>
    %188 = vector.shape_cast %187 : vector<1x128xbf16> to vector<1x1x128xbf16>
    %189 = vector.broadcast %188 : vector<1x1x128xbf16> to vector<2x16x128xbf16>
    %190 = arith.mulf %186, %189 : vector<2x16x128xbf16>
    %191 = arith.addf %184, %190 : vector<2x16x128xbf16>
    %c3_57 = arith.constant 3 : index
    %c0_58 = arith.constant 0 : index
    %c0_59 = arith.constant 0 : index
    %c0_60 = arith.constant 0 : index
    %192 = vector.load %arg2[%c3_57, %c0_58, %c0_59, %c0_60] : memref<6x2x16x128xbf16, #tpu.memory_space<vmem>>, vector<1x2x16x128xbf16>
    %193 = vector.shape_cast %192 : vector<1x2x16x128xbf16> to vector<2x16x128xbf16>
    %194 = vector.extract_strided_slice %171 {offsets = [3, 0], sizes = [1, 128], strides = [1, 1]} : vector<6x128xbf16> to vector<1x128xbf16>
    %195 = vector.shape_cast %194 : vector<1x128xbf16> to vector<1x1x128xbf16>
    %196 = vector.broadcast %195 : vector<1x1x128xbf16> to vector<2x16x128xbf16>
    %197 = arith.mulf %193, %196 : vector<2x16x128xbf16>
    %198 = arith.addf %191, %197 : vector<2x16x128xbf16>
    %c4_61 = arith.constant 4 : index
    %c0_62 = arith.constant 0 : index
    %c0_63 = arith.constant 0 : index
    %c0_64 = arith.constant 0 : index
    %199 = vector.load %arg2[%c4_61, %c0_62, %c0_63, %c0_64] : memref<6x2x16x128xbf16, #tpu.memory_space<vmem>>, vector<1x2x16x128xbf16>
    %200 = vector.shape_cast %199 : vector<1x2x16x128xbf16> to vector<2x16x128xbf16>
    %201 = vector.extract_strided_slice %171 {offsets = [4, 0], sizes = [1, 128], strides = [1, 1]} : vector<6x128xbf16> to vector<1x128xbf16>
    %202 = vector.shape_cast %201 : vector<1x128xbf16> to vector<1x1x128xbf16>
    %203 = vector.broadcast %202 : vector<1x1x128xbf16> to vector<2x16x128xbf16>
    %204 = arith.mulf %200, %203 : vector<2x16x128xbf16>
    %205 = arith.addf %198, %204 : vector<2x16x128xbf16>
    %c5_65 = arith.constant 5 : index
    %c0_66 = arith.constant 0 : index
    %c0_67 = arith.constant 0 : index
    %c0_68 = arith.constant 0 : index
    %206 = vector.load %arg2[%c5_65, %c0_66, %c0_67, %c0_68] : memref<6x2x16x128xbf16, #tpu.memory_space<vmem>>, vector<1x2x16x128xbf16>
    %207 = vector.shape_cast %206 : vector<1x2x16x128xbf16> to vector<2x16x128xbf16>
    %208 = vector.extract_strided_slice %171 {offsets = [5, 0], sizes = [1, 128], strides = [1, 1]} : vector<6x128xbf16> to vector<1x128xbf16>
    %209 = vector.shape_cast %208 : vector<1x128xbf16> to vector<1x1x128xbf16>
    %210 = vector.broadcast %209 : vector<1x1x128xbf16> to vector<2x16x128xbf16>
    %211 = arith.mulf %207, %210 : vector<2x16x128xbf16>
    %212 = arith.addf %205, %211 : vector<2x16x128xbf16>
    %213 = vector.broadcast %19 : vector<1x128xf32> to vector<16x128xf32>
    %214 = arith.mulf %3, %213 : vector<16x128xf32>
    %cst_69 = arith.constant 5.000000e-01 : f32
    %215 = vector.broadcast %cst_69 : f32 to vector<16x128xf32>
    %216 = arith.cmpf ogt, %214, %215 : vector<16x128xf32>
    %cst_70 = arith.constant 0.000000e+00 : f32
    %217 = vector.broadcast %cst_70 : f32 to vector<1x128xf32>
    %218 = vector.extract_strided_slice %212 {offsets = [0, 0, 0], sizes = [1, 16, 128], strides = [1, 1, 1]} : vector<2x16x128xbf16> to vector<1x16x128xbf16>
    %219 = vector.shape_cast %218 : vector<1x16x128xbf16> to vector<16x128xbf16>
    %220 = arith.extf %219 : vector<16x128xbf16> to vector<16x128xf32>
    %221 = vector.extract_strided_slice %1 {offsets = [0, 0, 0], sizes = [1, 16, 128], strides = [1, 1, 1]} : vector<2x16x128xbf16> to vector<1x16x128xbf16>
    %222 = vector.shape_cast %221 : vector<1x16x128xbf16> to vector<16x128xbf16>
    %223 = arith.extf %222 : vector<16x128xbf16> to vector<16x128xf32>
    %224 = arith.subf %220, %223 : vector<16x128xf32>
    %225 = math.absf %224 : vector<16x128xf32>
    %cst_71 = arith.constant 1.000000e+00 : f32
    %226 = vector.broadcast %cst_71 : f32 to vector<16x128xf32>
    %227 = arith.cmpf olt, %225, %226 : vector<16x128xf32>
    %cst_72 = arith.constant 5.000000e-01 : f32
    %228 = vector.broadcast %cst_72 : f32 to vector<16x128xf32>
    %229 = arith.mulf %228, %224 : vector<16x128xf32>
    %230 = arith.mulf %229, %224 : vector<16x128xf32>
    %cst_73 = arith.constant 5.000000e-01 : f32
    %231 = vector.broadcast %cst_73 : f32 to vector<16x128xf32>
    %232 = arith.subf %225, %231 : vector<16x128xf32>
    %233 = arith.select %227, %230, %232 : vector<16x128xi1>, vector<16x128xf32>
    %cst_74 = arith.constant 0.000000e+00 : f32
    %234 = vector.broadcast %cst_74 : f32 to vector<16x128xf32>
    %235 = arith.select %216, %233, %234 : vector<16x128xi1>, vector<16x128xf32>
    %cst_75 = arith.constant dense<0.000000e+00> : vector<128xf32>
    %236 = vector.multi_reduction <add>, %235, %cst_75 [0] : vector<16x128xf32> to vector<128xf32>
    %237 = vector.shape_cast %236 : vector<128xf32> to vector<1x128xf32>
    %238 = arith.addf %217, %237 : vector<1x128xf32>
    %239 = vector.extract_strided_slice %212 {offsets = [1, 0, 0], sizes = [1, 16, 128], strides = [1, 1, 1]} : vector<2x16x128xbf16> to vector<1x16x128xbf16>
    %240 = vector.shape_cast %239 : vector<1x16x128xbf16> to vector<16x128xbf16>
    %241 = arith.extf %240 : vector<16x128xbf16> to vector<16x128xf32>
    %242 = vector.extract_strided_slice %1 {offsets = [1, 0, 0], sizes = [1, 16, 128], strides = [1, 1, 1]} : vector<2x16x128xbf16> to vector<1x16x128xbf16>
    %243 = vector.shape_cast %242 : vector<1x16x128xbf16> to vector<16x128xbf16>
    %244 = arith.extf %243 : vector<16x128xbf16> to vector<16x128xf32>
    %245 = arith.subf %241, %244 : vector<16x128xf32>
    %246 = math.absf %245 : vector<16x128xf32>
    %cst_76 = arith.constant 1.000000e+00 : f32
    %247 = vector.broadcast %cst_76 : f32 to vector<16x128xf32>
    %248 = arith.cmpf olt, %246, %247 : vector<16x128xf32>
    %cst_77 = arith.constant 5.000000e-01 : f32
    %249 = vector.broadcast %cst_77 : f32 to vector<16x128xf32>
    %250 = arith.mulf %249, %245 : vector<16x128xf32>
    %251 = arith.mulf %250, %245 : vector<16x128xf32>
    %cst_78 = arith.constant 5.000000e-01 : f32
    %252 = vector.broadcast %cst_78 : f32 to vector<16x128xf32>
    %253 = arith.subf %246, %252 : vector<16x128xf32>
    %254 = arith.select %248, %251, %253 : vector<16x128xi1>, vector<16x128xf32>
    %cst_79 = arith.constant 0.000000e+00 : f32
    %255 = vector.broadcast %cst_79 : f32 to vector<16x128xf32>
    %256 = arith.select %216, %254, %255 : vector<16x128xi1>, vector<16x128xf32>
    %cst_80 = arith.constant dense<0.000000e+00> : vector<128xf32>
    %257 = vector.multi_reduction <add>, %256, %cst_80 [0] : vector<16x128xf32> to vector<128xf32>
    %258 = vector.shape_cast %257 : vector<128xf32> to vector<1x128xf32>
    %259 = arith.addf %238, %258 : vector<1x128xf32>
    %cst_81 = arith.constant dense<0.000000e+00> : vector<128xf32>
    %260 = vector.multi_reduction <add>, %214, %cst_81 [0] : vector<16x128xf32> to vector<128xf32>
    %261 = vector.shape_cast %260 : vector<128xf32> to vector<1x128xf32>
    %cst_82 = arith.constant 0.000000e+00 : f32
    %262 = vector.broadcast %cst_82 : f32 to vector<1x8x128xf32>
    %c0_83 = arith.constant 0 : index
    %c0_84 = arith.constant 0 : index
    %c0_85 = arith.constant 0 : index
    %263 = vector.load %arg5[%c0_83, %c0_84, %c0_85] : memref<1x8x128xf32, #tpu.memory_space<vmem>>, vector<1x8x128xf32>
    tpu.vector_store %arg5[%c0_83, %c0_84, %c0_85], %262 {strides = array<i32>} : memref<1x8x128xf32, #tpu.memory_space<vmem>>, vector<1x8x128xf32>,
    %c0_86 = arith.constant 0 : index
    %c0_87 = arith.constant 0 : index
    %c0_88 = arith.constant 0 : index
    %264 = vector.load %arg5[%c0_86, %c0_87, %c0_88] : memref<1x8x128xf32, #tpu.memory_space<vmem>>, vector<1x1x128xf32>
    %265 = vector.shape_cast %264 : vector<1x1x128xf32> to vector<1x128xf32>
    %266 = vector.shape_cast %164 : vector<1x128xf32> to vector<1x1x128xf32>
    tpu.vector_store %arg5[%c0_86, %c0_87, %c0_88], %266 {strides = array<i32>} : memref<1x8x128xf32, #tpu.memory_space<vmem>>, vector<1x1x128xf32>,
    %c0_89 = arith.constant 0 : index
    %c1_90 = arith.constant 1 : index
    %c0_91 = arith.constant 0 : index
    %267 = vector.load %arg5[%c0_89, %c1_90, %c0_91] : memref<1x8x128xf32, #tpu.memory_space<vmem>>, vector<1x1x128xf32>
    %268 = vector.shape_cast %267 : vector<1x1x128xf32> to vector<1x128xf32>
    %269 = vector.shape_cast %168 : vector<1x128xf32> to vector<1x1x128xf32>
    tpu.vector_store %arg5[%c0_89, %c1_90, %c0_91], %269 {strides = array<i32>} : memref<1x8x128xf32, #tpu.memory_space<vmem>>, vector<1x1x128xf32>,
    %c0_92 = arith.constant 0 : index
    %c2_93 = arith.constant 2 : index
    %c0_94 = arith.constant 0 : index
    %270 = vector.load %arg5[%c0_92, %c2_93, %c0_94] : memref<1x8x128xf32, #tpu.memory_space<vmem>>, vector<1x1x128xf32>
    %271 = vector.shape_cast %270 : vector<1x1x128xf32> to vector<1x128xf32>
    %272 = vector.shape_cast %259 : vector<1x128xf32> to vector<1x1x128xf32>
    tpu.vector_store %arg5[%c0_92, %c2_93, %c0_94], %272 {strides = array<i32>} : memref<1x8x128xf32, #tpu.memory_space<vmem>>, vector<1x1x128xf32>,
    %c0_95 = arith.constant 0 : index
    %c3_96 = arith.constant 3 : index
    %c0_97 = arith.constant 0 : index
    %273 = vector.load %arg5[%c0_95, %c3_96, %c0_97] : memref<1x8x128xf32, #tpu.memory_space<vmem>>, vector<1x1x128xf32>
    %274 = vector.shape_cast %273 : vector<1x1x128xf32> to vector<1x128xf32>
    %275 = vector.shape_cast %261 : vector<1x128xf32> to vector<1x1x128xf32>
    tpu.vector_store %arg5[%c0_95, %c3_96, %c0_97], %275 {strides = array<i32>} : memref<1x8x128xf32, #tpu.memory_space<vmem>>, vector<1x1x128xf32>,
    return
  }
  func.func @transform_0(%arg0: i32) -> (i32, i32) {
    %c0_i32 = arith.constant 0 : i32
    %c0_i32_0 = arith.constant 0 : i32
    return %c0_i32, %arg0 : i32, i32
  }
  func.func @transform_1(%arg0: i32) -> (i32, i32, i32, i32) {
    %c0_i32 = arith.constant 0 : i32
    %c0_i32_0 = arith.constant 0 : i32
    %c0_i32_1 = arith.constant 0 : i32
    %c0_i32_2 = arith.constant 0 : i32
    return %c0_i32, %c0_i32_0, %c0_i32_1, %arg0 : i32, i32, i32, i32
  }
  func.func @transform_2(%arg0: i32) -> (i32, i32, i32) {
    %c0_i32 = arith.constant 0 : i32
    %c0_i32_0 = arith.constant 0 : i32
    %c0_i32_1 = arith.constant 0 : i32
    return %c0_i32, %c0_i32_0, %arg0 : i32, i32, i32
  }
  func.func @transform_3(%arg0: i32) -> (i32, i32) {
    %c0_i32 = arith.constant 0 : i32
    %c0_i32_0 = arith.constant 0 : i32
    return %c0_i32, %arg0 : i32, i32
  }
  func.func @transform_4(%arg0: i32) -> (i32, i32, i32) {
    %c0_i32 = arith.constant 0 : i32
    %c0_i32_0 = arith.constant 0 : i32
    %c0_i32_1 = arith.constant 0 : i32
    return %arg0, %c0_i32, %c0_i32_0 : i32, i32, i32
  }
}

</mosaic_0001>

<bundles_post_ra>
// kernel: loss_fn.1
= control target key start
LH: loop header
LB: loop body
LE: loop exit
PB: predicated region body
PF: predicated region fallthrough
CT: control target
= control target key end

     0   :  { %s1255_s15 = smov 0   ;;  %s1257_s16 = smov 0   ;;  %s1684_s0 = inlined_call_operand.vmem [shape: f32[6,256], index: 0, kind: input, shape index: {}]   ;;  %s1685_s1 = inlined_call_operand.vmem [shape: bf16[6,2,16,256], index: 1, kind: input, shape index: {}]   ;;  %s1686_s2 = inlined_call_operand.vmem [shape: bf16[2,16,256], index: 2, kind: input, shape index: {}]   ;;  %s1687_s3 = inlined_call_operand.vmem [shape: bf16[16,256], index: 3, kind: input, shape index: {}]   ;;  %s1688_s4 = inlined_call_operand.vmem [shape: f32[2,8,128], index: 4, kind: output, shape index: {}]  }
   0x1   :  { %s1259_s17 = smov 0  }
   0x2 LB: > { %s1117_s18 = sadd.s32 4294967295, %s1227_s17   ;;  %s1272_s19 = sadd.s32 1, %s1227_s17   ;;  %s1227_s17 = sphi %s1259_s17, %s1728_s17   ;;  %s1223_s16 = sphi %s1257_s16, %s1727_s16   ;;  %s1219_s15 = sphi %s1255_s15, %s1726_s15  }
   0x3   : > { %s44_s20 = ssub.s32 %s1227_s17, %s1272_s19  ;;  %s47_s21 = sadd.s32 1, %s1223_s16 }
   0x4   : > { %p45_p0 = scmp.eq.s32.totalorder %s44_s20, 0  ;;  %p54_p1 = scmp.ne.s32.totalorder %s1223_s16, %s1219_s15 }
   0x5   : > { %p55_p2 = scmp.eq.s32.totalorder %s1227_s17, 0  ;;  %p1120_p4 = scmp.ge.s32.totalorder %s1227_s17, 2 }
   0x6   : > { %s1281_s22 = scalar_select %p45_p0, %s1223_s16, %s47_s21  }
   0x7   : > { %p1283_p3 = por %p55_p2, %p54_p1  ;;  %158 = sbr.rel (%p1120_p4) target bundleno = 48 (0x30), region = 16 }
   0xe   : > { %168 = sbr.rel (!%p1283_p3) target bundleno = 34 (0x22), region = 24  ;;  %s170_s24 = sand.u32 (%p1283_p3), 1, %s1223_s16  }
   0xf   : > { %s1121_s25 = sshll.u32 (%p1283_p3), %s1227_s17, 2  ;;  %s1176_s26 = smul.u32 (%p1283_p3), 96, %s170_s24 }
  0x10   : > { %s1295_s29 = scalar_lea.vmem (%p1283_p3), %s1685_s1, %s1121_s25 }
  0x11   : > { %v190_v0 = vld [vmem:[%s1295_s29] sm:$0xf] (%p1283_p3)  ;;  %v192_v1 = vld [vmem:[%s1295_s29 + $0x8] sm:$0xf] (%p1283_p3)  ;;  %v194_v2 = vld [vmem:[%s1295_s29 + $0x10] sm:$0xf] (%p1283_p3) }
  0x12   : > { %v196_v3 = vld [vmem:[%s1295_s29 + $0x18] sm:$0xf] (%p1283_p3)  ;;  %v198_v4 = vld [vmem:[%s1295_s29 + $0x20] sm:$0xf] (%p1283_p3)  ;;  %s1302_s30 = scalar_lea.vmem (%p1283_p3), [#allocation2], %s1176_s26 }
  0x13   : > { %191 = vst [vmem:[%s1302_s30] sm:$0xf] (%p1283_p3), %v190_v0  ;;  %193 = vst [vmem:[%s1302_s30 + $0x4] sm:$0xf] (%p1283_p3), %v192_v1  ;;  %v200_v5 = vld [vmem:[%s1295_s29 + $0x28] sm:$0xf] (%p1283_p3) }
  0x14   : > { %195 = vst [vmem:[%s1302_s30 + $0x8] sm:$0xf] (%p1283_p3), %v194_v2  ;;  %197 = vst [vmem:[%s1302_s30 + $0xc] sm:$0xf] (%p1283_p3), %v196_v3  ;;  %v202_v6 = vld [vmem:[%s1295_s29 + $0x30] sm:$0xf] (%p1283_p3) }
  0x15   : > { %199 = vst [vmem:[%s1302_s30 + $0x10] sm:$0xf] %v198_v4  ;;  %v204_v7 = vld [vmem:[%s1295_s29 + $0x38] sm:$0xf]  ;;  %201 = vst [vmem:[%s1302_s30 + $0x14] sm:$0xf] %v200_v5 }
  0x16   : > { %203 = vst [vmem:[%s1302_s30 + $0x18] sm:$0xf] %v202_v6  ;;  %205 = vst [vmem:[%s1302_s30 + $0x1c] sm:$0xf] %v204_v7  ;;  %v206_v8 = vld [vmem:[%s1295_s29 + $0x40] sm:$0xf] }
  0x17   : > { %v208_v9 = vld [vmem:[%s1295_s29 + $0x48] sm:$0xf]  ;;  %v210_v10 = vld [vmem:[%s1295_s29 + $0x50] sm:$0xf]  ;;  %207 = vst [vmem:[%s1302_s30 + $0x20] sm:$0xf] %v206_v8 }
  0x18   : > { %209 = vst [vmem:[%s1302_s30 + $0x24] sm:$0xf] %v208_v9  ;;  %211 = vst [vmem:[%s1302_s30 + $0x28] sm:$0xf] %v210_v10  ;;  %v212_v11 = vld [vmem:[%s1295_s29 + $0x58] sm:$0xf] }
  0x19   : > { %v214_v12 = vld [vmem:[%s1295_s29 + $0x60] sm:$0xf]  ;;  %v216_v13 = vld [vmem:[%s1295_s29 + $0x68] sm:$0xf]  ;;  %213 = vst [vmem:[%s1302_s30 + $0x2c] sm:$0xf] %v212_v11 }
  0x1a   : > { %215 = vst [vmem:[%s1302_s30 + $0x30] sm:$0xf] %v214_v12  ;;  %217 = vst [vmem:[%s1302_s30 + $0x34] sm:$0xf] %v216_v13  ;;  %v218_v14 = vld [vmem:[%s1295_s29 + $0x70] sm:$0xf] }
  0x1b   : > { %v220_v15 = vld [vmem:[%s1295_s29 + $0x78] sm:$0xf]  ;;  %v222_v16 = vld [vmem:[%s1295_s29 + $0x80] sm:$0xf]  ;;  %219 = vst [vmem:[%s1302_s30 + $0x38] sm:$0xf] %v218_v14 }
  0x1c   : > { %221 = vst [vmem:[%s1302_s30 + $0x3c] sm:$0xf] %v220_v15  ;;  %223 = vst [vmem:[%s1302_s30 + $0x40] sm:$0xf] %v222_v16  ;;  %v224_v17 = vld [vmem:[%s1295_s29 + $0x88] sm:$0xf] }
  0x1d   : > { %v226_v18 = vld [vmem:[%s1295_s29 + $0x90] sm:$0xf]  ;;  %v228_v19 = vld [vmem:[%s1295_s29 + $0x98] sm:$0xf]  ;;  %225 = vst [vmem:[%s1302_s30 + $0x44] sm:$0xf] %v224_v17 }
  0x1e   : > { %227 = vst [vmem:[%s1302_s30 + $0x48] sm:$0xf] %v226_v18  ;;  %229 = vst [vmem:[%s1302_s30 + $0x4c] sm:$0xf] %v228_v19  ;;  %v230_v20 = vld [vmem:[%s1295_s29 + $0xa0] sm:$0xf] }
  0x1f   : > { %v232_v21 = vld [vmem:[%s1295_s29 + $0xa8] sm:$0xf]  ;;  %v234_v22 = vld [vmem:[%s1295_s29 + $0xb0] sm:$0xf]  ;;  %231 = vst [vmem:[%s1302_s30 + $0x50] sm:$0xf] %v230_v20 }
  0x20   : > { %233 = vst [vmem:[%s1302_s30 + $0x54] sm:$0xf] %v232_v21  ;;  %235 = vst [vmem:[%s1302_s30 + $0x58] sm:$0xf] %v234_v22  ;;  %v236_v23 = vld [vmem:[%s1295_s29 + $0xb8] sm:$0xf] }
  0x21   : > { %237 = vst [vmem:[%s1302_s30 + $0x5c] sm:$0xf] %v236_v23 }
  0x22 PF: > { %308 = sbr.rel (!%p1283_p3) target bundleno = 41 (0x29), region = 65  ;;  %s310_s5 = sand.u32 (%p1283_p3), 1, %s1223_s16  }
  0x23   : > { %s1123_s6 = sshll.u32 (%p1283_p3), %s1227_s17, 2  ;;  %s1122_s7 = sshll.u32 (%p1283_p3), %s310_s5, 4 }
  0x24   : > { %s314_s10 = scalar_lea.vmem (%p1283_p3), %s1686_s2, %s1123_s6  ;;  %s312_s11 = scalar_lea.vmem (%p1283_p3), [#allocation3], %s1122_s7 }
  0x25   : > { %v330_v24 = vld [vmem:[%s314_s10] sm:$0xf] (%p1283_p3)  ;;  %v332_v25 = vld [vmem:[%s314_s10 + $0x8] sm:$0xf] (%p1283_p3)  ;;  %v334_v26 = vld [vmem:[%s314_s10 + $0x10] sm:$0xf] (%p1283_p3) }
  0x26   : > { %331 = vst [vmem:[%s312_s11] sm:$0xf] (%p1283_p3), %v330_v24  ;;  %333 = vst [vmem:[%s312_s11 + $0x4] sm:$0xf] (%p1283_p3), %v332_v25  ;;  %v336_v27 = vld [vmem:[%s314_s10 + $0x18] sm:$0xf] (%p1283_p3) }
  0x27   : > { %335 = vst [vmem:[%s312_s11 + $0x8] sm:$0xf] (%p1283_p3), %v334_v26  ;;  %337 = vst [vmem:[%s312_s11 + $0xc] sm:$0xf] (%p1283_p3), %v336_v27 }
  0x29 PF: > { %368 = sbr.rel (!%p1283_p3) target bundleno = 48 (0x30), region = 106  ;;  %s370_s12 = sand.u32 (%p1283_p3), 1, %s1223_s16  }
  0x2a   : > { %s1125_s13 = sshll.u32 (%p1283_p3), %s1227_s17, 2  ;;  %s1124_s14 = sshll.u32 (%p1283_p3), %s370_s12, 3 }
  0x2b   : > { %s374_s24 = scalar_lea.vmem (%p1283_p3), %s1687_s3, %s1125_s13  ;;  %s372_s25 = scalar_lea.vmem (%p1283_p3), [#allocation4], %s1124_s14 }
  0x2c   : > { %v390_v28 = vld [vmem:[%s374_s24] sm:$0xf] (%p1283_p3)  ;;  %v392_v29 = vld [vmem:[%s374_s24 + $0x8] sm:$0xf] (%p1283_p3) }
  0x2d   : > { %391 = vst [vmem:[%s372_s25] sm:$0xf] (%p1283_p3), %v390_v28  ;;  %393 = vst [vmem:[%s372_s25 + $0x4] sm:$0xf] (%p1283_p3), %v392_v29 }
  0x30 PF: > { %p1126_p5 = scmp.ge.s32.totalorder %s1227_s17, 1  ;;  %p419_p6 = scmp.lt.s32.totalorder %s1227_s17, 3 }
  0x32   : > { %p420_p7 = pnand %p1126_p5, %p419_p6 }
  0x34   : > { %423 = sbr.rel (%p420_p7) target bundleno = 254 (0xfe), region = 147 }
  0x3b   : > { %s1364_s23 = sand.u32 1, %s1219_s15   ;;  %p476_p8 = scmp.lt.s32.totalorder %s1117_s18, 1  ;;  %v493_v30 = vlaneseq  ;;  %v1689_v39 = vmov 0.0   ;;  %vm767_vm3 = vcmask 1040384   ;;  %vm769_vm4 = vcmask 1041408  }
  0x3c   : > { %s1128_s26 = sshll.u32 %s1364_s23, 3  ;;  %s1177_s30 = smul.u32 96, %s1364_s23  ;;  %vm771_vm5 = vcmask 1042432   ;;  %vm773_vm6 = vcmask 1043456   ;;  %vm775_vm7 = vcmask 1044480   ;;  %vm784_vm10 = vcmask 1045504  }
  0x3d   : > { %v1369_v31 = vshrl.u32 %v493_v30, 7  ;;  %s1730_s18 = smov (!%p476_p8, %s1117_s18), 1  ;;  %s442_s27 = scalar_lea.vmem [#allocation4], %s1128_s26 }
  0x3e   : > { %v1375_v32 = vld [vmem:[%s442_s27] sm:$0xff]   ;;  %s1129_s15 = sshll.u32 %s1730_s18, 3  ;;  %s1127_s5 = sshll.u32 %s1364_s23, 4 }
  0x3f   : > { %v1378_v33 = vcvt.s32.f32 %v1369_v31  ;;  %v1692_v34 = vunpack.c.l.bf16 %v1375_v32  ;;  %v495_v35 = vadd.s32 8, %v1369_v31  ;;  %s1389_s29 = scalar_lea.vmem %s1688_s4, %s1129_s15  ;;  %v1691_v37 = vunpack.c.h.bf16 %v1375_v32  ;;  %s435_s6 = scalar_lea.vmem [#allocation3], %s1127_s5 }
  0x40   : > { %1005 = vst [vmem:[%s1389_s29] sm:$0xff] %v1689_v39  ;;  %v1402_v50 = vld [vmem:[%s435_s6] sm:$0xf]  ;;  %v1404_v51 = vld [vmem:[%s435_s6 + $0x4] sm:$0xf]  ;;  %v1406_v52 = vld [vmem:[%s435_s6 + $0x8] sm:$0xf]  ;;  %s479_s10 = scalar_lea.vmem %s1684_s0, %s1129_s15 }
  0x41   : > { %v498_v36 = vmul.f32 0.00625, %v1378_v33  ;;  %v497_v38 = vcvt.s32.f32 %v495_v35  ;;  %1701 = vst [vmem:[#allocation5_spill] sm:$0xff] %v1406_v52  ;;  %v1410_v53 = vld [vmem:[%s435_s6 + $0xc] sm:$0xf]  ;;  %s1414_s7 = scalar_lea.vmem [#allocation2], %s1177_s30 }
  0x42   : > { %1702 = vst [vmem:[#allocation6_spill] sm:$0xff] %v1410_v53  ;;  %v1417_v56 = vld [vmem:[%s1414_s7] sm:$0xf]  ;;  %v1424_v59 = vld [vmem:[%s1414_s7 + $0x4] sm:$0xf] }
  0x43   : > { %v499_v40 = vmul.f32 0.00625, %v497_v38  ;;  %v500_v41 = vadd.f32 %v1692_v34, %v498_v36  ;;  %v1427_v60 = vld [vmem:[%s1414_s7 + $0x8] sm:$0xf]  ;;  %v1430_v61 = vld [vmem:[%s1414_s7 + $0xc] sm:$0xf] }
  0x44   : > { %v1449_v6 = vld [vmem:[%s1414_s7 + $0x10] sm:$0xf]  ;;  %v1452_v7 = vld [vmem:[%s1414_s7 + $0x14] sm:$0xf]  ;;  %v1455_v12 = vld [vmem:[%s1414_s7 + $0x18] sm:$0xf] }
  0x45   : > { %v501_v42 = vadd.f32 %v1691_v37, %v499_v40  ;;  %v1458_v13 = vld [vmem:[%s1414_s7 + $0x1c] sm:$0xf]  ;;  %v1469_v26 = vld [vmem:[%s1414_s7 + $0x20] sm:$0xf]  ;;  %v1472_v35 = vld [vmem:[%s1414_s7 + $0x24] sm:$0xf] }
  0x46   : > { %v1554_v37 = vld [vmem:[%s1414_s7 + $0x5c] sm:$0xf] }
  0x47   : > { %v502_v43 = vmax.f32 %v500_v41, %v501_v42  ;;  %1707 = vst [vmem:[#allocation11_spill] sm:$0xff] %v1554_v37 }
  0x49   : > { %v503_v44 = vrot.slane %v502_v43, 4 }
  0x4b   : > { %v504_v45 = vmax.f32 %v502_v43, %v503_v44 }
  0x4d   : > { %v505_v46 = vrot.slane %v504_v45, 2 }
  0x4f   : > { %v506_v47 = vmax.f32 %v504_v45, %v505_v46  ;;  %v1478_v46 = vld [vmem:[%s1414_s7 + $0x2c] sm:$0xf] }
  0x51   : > { %v507_v48 = vrot.slane %v506_v47, 1 }
  0x53   : > { %v1400_v49 = vmax.f32 %v506_v47, %v507_v48 }
  0x55   : > { %vm509_vm0 = vcmp.eq.f32.partialorder %v500_v41, %v1400_v49  ;;  %vm510_vm1 = vcmp.eq.f32.partialorder %v501_v42, %v1400_v49  ;;  %v1475_v42 = vld [vmem:[%s1414_s7 + $0x28] sm:$0xf]  ;;  %vm516_vm2 = vcmp.gt.f32.partialorder %v1400_v49, 1.0 }
  0x56   : > { %v1131_v54 = vsel %vm509_vm0, 1.0, %v1689_v39  ;;  %v1132_v55 = vsel %vm510_vm1, 1.0, %v1689_v39 }
  0x57   : > { %v1419_v57 = vpack.c.bf16 %v1131_v54, %v1131_v54  ;;  %v1421_v58 = vpack.c.bf16 %v1132_v55, %v1132_v55 }
  0x59   : > { %v526_v62 = vmul.bf16 %v1419_v57, %v1402_v50  ;;  %v527_v63 = vmul.bf16 %v1421_v58, %v1404_v51  ;;  %v528_v0 = vmul.bf16 %v1419_v57, %v1406_v52  ;;  %v529_v1 = vmul.bf16 %v1421_v58, %v1410_v53 }
  0x5a   : > { %v556_v2 = vmul.bf16 %v1419_v57, %v1417_v56  ;;  %v557_v3 = vmul.bf16 %v1421_v58, %v1424_v59  ;;  %v558_v4 = vmul.bf16 %v1419_v57, %v1427_v60  ;;  %v559_v5 = vmul.bf16 %v1421_v58, %v1430_v61 }
  0x5b   : > { %v530_v8 = vunpack.c.l.bf16 %v526_v62  ;;  %v531_v9 = vunpack.c.l.bf16 %v527_v63  ;;  %v532_v10 = vunpack.c.l.bf16 %v528_v0  ;;  %v533_v11 = vunpack.c.l.bf16 %v529_v1 }
  0x5c   : > { %v560_v14 = vunpack.c.l.bf16 %v556_v2  ;;  %v561_v15 = vunpack.c.l.bf16 %v557_v3  ;;  %v562_v16 = vunpack.c.l.bf16 %v558_v4  ;;  %v563_v17 = vunpack.c.l.bf16 %v559_v5 }
  0x5d   : > { %v534_v18 = vadd.f32 %v531_v9, %v530_v8  ;;  %v541_v19 = vadd.f32 %v533_v11, %v532_v10  ;;  %v592_v20 = vmul.bf16 %v1419_v57, %v1449_v6  ;;  %v593_v21 = vmul.bf16 %v1421_v58, %v1452_v7 }
  0x5e   : > { %v564_v22 = vadd.f32 %v561_v15, %v560_v14  ;;  %v571_v23 = vadd.f32 %v563_v17, %v562_v16  ;;  %v594_v24 = vmul.bf16 %v1419_v57, %v1455_v12  ;;  %v595_v25 = vmul.bf16 %v1421_v58, %v1458_v13 }
  0x5f   : > { %v535_v27 = vrot.slane %v534_v18, 4  ;;  %v542_v28 = vrot.slane %v541_v19, 4  ;;  %v596_v29 = vunpack.c.l.bf16 %v592_v20  ;;  %v597_v30 = vunpack.c.l.bf16 %v593_v21 }
  0x60   : > { %v565_v36 = vrot.slane %v564_v22, 4  ;;  %v572_v38 = vrot.slane %v571_v23, 4  ;;  %v598_v40 = vunpack.c.l.bf16 %v594_v24  ;;  %v599_v41 = vunpack.c.l.bf16 %v595_v25 }
  0x61   : > { %v536_v43 = vadd.f32 %v535_v27, %v534_v18  ;;  %v543_v44 = vadd.f32 %v542_v28, %v541_v19  ;;  %v600_v45 = vadd.f32 %v597_v30, %v596_v29  ;;  %v628_v47 = vmul.bf16 %v1419_v57, %v1469_v26 }
  0x62   : > { %v566_v48 = vadd.f32 %v565_v36, %v564_v22  ;;  %v573_v54 = vadd.f32 %v572_v38, %v571_v23  ;;  %v607_v55 = vadd.f32 %v599_v41, %v598_v40  ;;  %v629_v62 = vmul.bf16 %v1421_v58, %v1472_v35 }
  0x63   : > { %v537_v63 = vrot.slane %v536_v43, 2  ;;  %v544_v0 = vrot.slane %v543_v44, 2  ;;  %v601_v1 = vrot.slane %v600_v45, 4  ;;  %v630_v2 = vmul.bf16 %v1419_v57, %v1475_v42 }
  0x64   : > { %v567_v3 = vrot.slane %v566_v48, 2  ;;  %v574_v4 = vrot.slane %v573_v54, 2  ;;  %v608_v5 = vrot.slane %v607_v55, 4  ;;  %v631_v8 = vmul.bf16 %v1421_v58, %v1478_v46 }
  0x65   : > { %v538_v9 = vadd.f32 %v537_v63, %v536_v43  ;;  %v545_v10 = vadd.f32 %v544_v0, %v543_v44  ;;  %v602_v11 = vadd.f32 %v601_v1, %v600_v45  ;;  %v632_v14 = vunpack.c.l.bf16 %v628_v47 }
  0x66   : > { %v568_v15 = vadd.f32 %v567_v3, %v566_v48  ;;  %v575_v16 = vadd.f32 %v574_v4, %v573_v54  ;;  %v609_v17 = vadd.f32 %v608_v5, %v607_v55  ;;  %v633_v18 = vunpack.c.l.bf16 %v629_v62  ;;  %v1489_v55 = vld [vmem:[%s1414_s7 + $0x30] sm:$0xf]  ;;  %v1492_v62 = vld [vmem:[%s1414_s7 + $0x34] sm:$0xf]  ;;  %v1495_v3 = vld [vmem:[%s1414_s7 + $0x38] sm:$0xf] }
  0x67   : > { %v539_v19 = vrot.slane %v538_v9, 1  ;;  %v546_v20 = vrot.slane %v545_v10, 1  ;;  %v603_v21 = vrot.slane %v602_v11, 2  ;;  %v634_v22 = vunpack.c.l.bf16 %v630_v2  ;;  %v1498_v4 = vld [vmem:[%s1414_s7 + $0x3c] sm:$0xf] }
  0x68   : > { %v569_v23 = vrot.slane %v568_v15, 1  ;;  %v576_v24 = vrot.slane %v575_v16, 1  ;;  %v610_v25 = vrot.slane %v609_v17, 2  ;;  %v635_v27 = vunpack.c.l.bf16 %v631_v8 }
  0x69   : > { %v540_v28 = vadd.f32 %v539_v19, %v538_v9  ;;  %v604_v29 = vadd.f32 %v603_v21, %v602_v11  ;;  %v636_v30 = vadd.f32 %v633_v18, %v632_v14  ;;  %v547_v36 = vadd.f32 %v546_v20, %v545_v10 }
  0x6a   : > { %v570_v38 = vadd.f32 %v569_v23, %v568_v15  ;;  %v577_v40 = vadd.f32 %v576_v24, %v575_v16  ;;  %v643_v41 = vadd.f32 %v635_v27, %v634_v22  ;;  %v611_v43 = vadd.f32 %v610_v25, %v609_v17 }
  0x6b   : > { %v637_v44 = vrot.slane %v636_v30, 4  ;;  %v548_v45 = vpack.c.bf16 %v540_v28, %v540_v28  ;;  %v605_v48 = vrot.slane %v604_v29, 1  ;;  %v549_v0 = vpack.c.bf16 %v547_v36, %v547_v36  ;;  %v1514_v28 = vld [vmem:[%s1414_s7 + $0x40] sm:$0xf] }
  0x6c   : > { %v578_v47 = vpack.c.bf16 %v570_v38, %v570_v38  ;;  %v644_v54 = vrot.slane %v643_v41, 4  ;;  %v579_v1 = vpack.c.bf16 %v577_v40, %v577_v40  ;;  %v612_v5 = vrot.slane %v611_v43, 1 }
  0x6d   : > { %v638_v63 = vadd.f32 %v637_v44, %v636_v30  ;;  %v664_v9 = vmul.bf16 %v1419_v57, %v1489_v55  ;;  %v665_v10 = vmul.bf16 %v1421_v58, %v1492_v62  ;;  %v1504_v11 = vunpack.c.l.bf16 %v548_v45 }
  0x6e   : > { %v645_v2 = vadd.f32 %v644_v54, %v643_v41  ;;  %v580_v14 = vunpack.c.l.bf16 %v578_v47  ;;  %v606_v15 = vadd.f32 %v605_v48, %v604_v29  ;;  %v666_v18 = vmul.bf16 %v1419_v57, %v1495_v3  ;;  %v1517_v29 = vld [vmem:[%s1414_s7 + $0x44] sm:$0xf]  ;;  %v1521_v41 = vld [vmem:[%s1414_s7 + $0x48] sm:$0xf]  ;;  %v1529_v48 = vld [vmem:[%s1414_s7 + $0x4c] sm:$0xf] }
  0x6f   : > { %v639_v8 = vrot.slane %v638_v63, 2  ;;  %v667_v19 = vmul.bf16 %v1421_v58, %v1498_v4  ;;  %v1511_v20 = vunpack.c.l.bf16 %v549_v0  ;;  %v581_v21 = vunpack.c.l.bf16 %v579_v1  ;;  %1703 = vst [vmem:[#allocation7_spill] sm:$0xff] %v1529_v48 }
  0x70   : > { %v646_v16 = vrot.slane %v645_v2, 2  ;;  %v613_v23 = vadd.f32 %v612_v5, %v611_v43  ;;  %v668_v25 = vunpack.c.l.bf16 %v664_v9  ;;  %v669_v27 = vunpack.c.l.bf16 %v665_v10  ;;  %v1539_v10 = vld [vmem:[%s1414_s7 + $0x50] sm:$0xf] }
  0x71   : > { %v640_v17 = vadd.f32 %v639_v8, %v638_v63  ;;  %v582_v30 = vsub.f32 %v580_v14, %v1504_v11  ;;  %v614_v36 = vpack.c.bf16 %v606_v15, %v606_v15  ;;  %v670_v40 = vunpack.c.l.bf16 %v666_v18  ;;  %1704 = vst [vmem:[#allocation8_spill] sm:$0xff] %v1539_v10 }
  0x72   : > { %v647_v22 = vadd.f32 %v646_v16, %v645_v2  ;;  %v1526_v44 = vsel %vm516_vm2, 1.0, %v1689_v39  ;;  %v671_v45 = vunpack.c.l.bf16 %v667_v19  ;;  %v672_v47 = vadd.f32 %v669_v27, %v668_v25 }
  0x73   : > { %v641_v24 = vrot.slane %v640_v17, 1  ;;  %v583_v54 = vsub.f32 %v581_v21, %v1511_v20  ;;  %v700_v0 = vmul.bf16 %v1419_v57, %v1514_v28  ;;  %v701_v1 = vmul.bf16 %v1421_v58, %v1517_v29 }
  0x74   : > { %v648_v38 = vrot.slane %v647_v22, 1  ;;  %v615_v2 = vpack.c.bf16 %v613_v23, %v613_v23  ;;  %v673_v5 = vrot.slane %v672_v47, 4  ;;  %v679_v8 = vadd.f32 %v671_v45, %v670_v40  ;;  %v1546_v23 = vld [vmem:[%s1414_s7 + $0x54] sm:$0xf] }
  0x75   : > { %v642_v43 = vadd.f32 %v641_v24, %v640_v17  ;;  %v702_v9 = vmul.bf16 %v1419_v57, %v1521_v41  ;;  %v1541_v14 = vmul.f32 %v582_v30, %v582_v30  ;;  %v616_v15 = vunpack.c.l.bf16 %v614_v36  ;;  %1705 = vst [vmem:[#allocation9_spill] sm:$0xff] %v1546_v23  ;;  %v1549_v24 = vld [vmem:[%s1414_s7 + $0x58] sm:$0xf] }
  0x76   : > { %v649_v63 = vadd.f32 %v648_v38, %v647_v22  ;;  %v703_v16 = vmul.bf16 %v1421_v58, %v1529_v48  ;;  %v704_v17 = vunpack.c.l.bf16 %v700_v0  ;;  %v674_v19 = vadd.f32 %v673_v5, %v672_v47  ;;  %1706 = vst [vmem:[#allocation10_spill] sm:$0xff] %v1549_v24 }
  0x77   : > { %v650_v18 = vpack.c.bf16 %v642_v43, %v642_v43  ;;  %v680_v21 = vrot.slane %v679_v8, 4  ;;  %v705_v22 = vunpack.c.l.bf16 %v701_v1  ;;  %v706_v27 = vunpack.c.l.bf16 %v702_v9 }
  0x78   : > { %v651_v25 = vpack.c.bf16 %v649_v63, %v649_v63  ;;  %v707_v38 = vunpack.c.l.bf16 %v703_v16  ;;  %v736_v30 = vmul.bf16 %v1419_v57, %v1539_v10  ;;  %v617_v36 = vunpack.c.l.bf16 %v615_v2 }
  0x79   : > { %v675_v40 = vrot.slane %v674_v19, 2  ;;  %v681_v45 = vadd.f32 %v680_v21, %v679_v8  ;;  %v708_v39 = vadd.f32 %v705_v22, %v704_v17  ;;  %v618_v43 = vsub.f32 %v616_v15, %v1504_v11 }
  0x7a   : > { %v715_v47 = vadd.f32 %v707_v38, %v706_v27  ;;  %v737_v0 = vmul.bf16 %v1421_v58, %v1546_v23  ;;  %v738_v63 = vmul.bf16 %v1419_v57, %v1549_v24  ;;  %v652_v1 = vunpack.c.l.bf16 %v650_v18 }
  0x7b   : > { %v676_v5 = vadd.f32 %v675_v40, %v674_v19  ;;  %v682_v9 = vrot.slane %v681_v45, 2  ;;  %v709_v16 = vrot.slane %v708_v39, 4  ;;  %v653_v34 = vunpack.c.l.bf16 %v651_v25 }
  0x7c   : > { %v716_v2 = vrot.slane %v715_v47, 4  ;;  %v739_v8 = vmul.bf16 %v1421_v58, %v1554_v37  ;;  %v740_v17 = vunpack.c.l.bf16 %v736_v30  ;;  %v741_v27 = vunpack.c.l.bf16 %v737_v0 }
  0x7d   : > { %v677_v21 = vrot.slane %v676_v5, 1  ;;  %v683_v22 = vadd.f32 %v682_v9, %v681_v45  ;;  %v710_v15 = vadd.f32 %v709_v16, %v708_v39  ;;  %v619_v38 = vsub.f32 %v617_v36, %v1511_v20 }
  0x7e   : > { %v717_v53 = vadd.f32 %v716_v2, %v715_v47  ;;  %v742_v52 = vunpack.c.l.bf16 %v738_v63  ;;  %v743_v23 = vunpack.c.l.bf16 %v739_v8  ;;  %v744_v40 = vadd.f32 %v741_v27, %v740_v17 }
  0x7f   : > { %v678_v57 = vadd.f32 %v677_v21, %v676_v5  ;;  %v684_v18 = vrot.slane %v683_v22, 1  ;;  %v711_v19 = vrot.slane %v710_v15, 2  ;;  %v654_v25 = vsub.f32 %v652_v1, %v1504_v11 }
  0x80   : > { %v655_v24 = vsub.f32 %v653_v34, %v1511_v20  ;;  %v718_v10 = vrot.slane %v717_v53, 2  ;;  %v751_v58 = vadd.f32 %v743_v23, %v742_v52  ;;  %v745_v39 = vrot.slane %v744_v40, 4 }
  0x81   : > { %v685_v30 = vadd.f32 %v684_v18, %v683_v22  ;;  %v686_v37 = vpack.c.bf16 %v678_v57, %v678_v57  ;;  %v712_v45 = vadd.f32 %v711_v19, %v710_v15  ;;  %v585_v0 = vmul.f32 %v583_v54, %v583_v54 }
  0x82   : > { %v620_v9 = vmul.f32 %v618_v43, %v618_v43  ;;  %v719_v36 = vadd.f32 %v718_v10, %v717_v53  ;;  %v752_v47 = vrot.slane %v751_v58, 4  ;;  %v746_v2 = vadd.f32 %v745_v39, %v744_v40 }
  0x83   : > { %v687_v63 = vpack.c.bf16 %v685_v30, %v685_v30  ;;  %v688_v16 = vunpack.c.l.bf16 %v686_v37  ;;  %v713_v5 = vrot.slane %v712_v45, 1  ;;  %v621_v8 = vmul.f32 %v619_v38, %v619_v38 }
  0x84   : > { %v656_v17 = vmul.f32 %v654_v25, %v654_v25  ;;  %v720_v21 = vrot.slane %v719_v36, 1  ;;  %v753_v1 = vadd.f32 %v752_v47, %v751_v58  ;;  %v657_v27 = vmul.f32 %v655_v24, %v655_v24 }
  0x85   : > { %v689_v34 = vunpack.c.l.bf16 %v687_v63  ;;  %v714_v48 = vadd.f32 %v713_v5, %v712_v45  ;;  %v747_v52 = vrot.slane %v746_v2, 2  ;;  %v690_v23 = vsub.f32 %v688_v16, %v1504_v11 }
  0x86   : > { %v721_v22 = vadd.f32 %v720_v21, %v719_v36  ;;  %v754_v15 = vrot.slane %v753_v1, 2  ;;  %v1708_v53 = vunpack.c.l.bf16 %v1375_v32  ;;  %v1709_v38 = vunpack.c.h.bf16 %v1375_v32 }
  0x87   : > { %v691_v37 = vsub.f32 %v689_v34, %v1511_v20  ;;  %v722_v10 = vpack.c.bf16 %v714_v48, %v714_v48  ;;  %v748_v43 = vadd.f32 %v747_v52, %v746_v2  ;;  %v586_v57 = vadd.f32 %v585_v0, %v1541_v14 }
  0x88   : > { %v1570_v54 = vmul.f32 %v1708_v53, %v1526_v44  ;;  %v1576_v24 = vmul.f32 %v1709_v38, %v1526_v44  ;;  %v622_v18 = vadd.f32 %v621_v8, %v620_v9  ;;  %v723_v19 = vpack.c.bf16 %v721_v22, %v721_v22 }
  0x89   : > { %v755_v40 = vadd.f32 %v754_v15, %v753_v1  ;;  %v724_v25 = vunpack.c.l.bf16 %v722_v10  ;;  %v749_v58 = vrot.slane %v748_v43, 1  ;;  %v692_v45 = vmul.f32 %v690_v23, %v690_v23 }
  0x8a   : > { %v998_v30 = vadd.f32 %v1576_v24, %v1570_v54  ;;  %v693_v39 = vmul.f32 %v691_v37, %v691_v37  ;;  %v725_v48 = vunpack.c.l.bf16 %v723_v19  ;;  %v658_v47 = vadd.f32 %v657_v27, %v656_v17 }
  0x8b   : > { %v756_v36 = vrot.slane %v755_v40, 1  ;;  %v726_v32 = vsub.f32 %v724_v25, %v1504_v11  ;;  %v750_v44 = vadd.f32 %v749_v58, %v748_v43  ;;  %v768_v9 = vsel %vm767_vm3, %v586_v57, %v622_v18 }
  0x8c   : > { %v999_v63 = vrot.slane %v998_v30, 4  ;;  %v727_v14 = vsub.f32 %v725_v48, %v1511_v20  ;;  %v694_v8 = vadd.f32 %v693_v39, %v692_v45  ;;  %v770_v52 = vsel %vm769_vm4, %v768_v9, %v658_v47 }
  0x8d   : > { %v757_v0 = vadd.f32 %v756_v36, %v755_v40  ;;  %v728_v16 = vmul.f32 %v726_v32, %v726_v32  ;;  %v758_v5 = vpack.c.bf16 %v750_v44, %v750_v44 }
  0x8e   : > { %v1000_v2 = vadd.f32 %v999_v63, %v998_v30  ;;  %v729_v21 = vmul.f32 %v727_v14, %v727_v14  ;;  %v772_v37 = vsel %vm771_vm5, %v770_v52, %v694_v8  ;;  %v484_v8 = vld [vmem:[%s479_s10] sm:$0x3f]  ;;  %vm940_vm5 = vcmp.gt.f32.partialorder %v1570_v54, 0.5 }
  0x8f   : > { %v759_v1 = vpack.c.bf16 %v757_v0, %v757_v0  ;;  %v760_v34 = vunpack.c.l.bf16 %v758_v5 }
  0x90   : > { %v1001_v17 = vrot.slane %v1000_v2, 2  ;;  %v730_v23 = vadd.f32 %v729_v21, %v728_v16 }
  0x91   : > { %v761_v27 = vunpack.c.l.bf16 %v759_v1  ;;  %v762_v22 = vsub.f32 %v760_v34, %v1504_v11  ;;  %v1710_v34 = vmov 0.0  }
  0x92   : > { %v1002_v15 = vadd.f32 %v1001_v17, %v1000_v2  ;;  %v774_v57 = vsel %vm773_vm6, %v772_v37, %v730_v23  ;;  %v845_v17 = vsub.s32 0, %v1369_v31  ;;  %vm941_vm6 = vcmp.gt.f32.partialorder %v1576_v24, 0.5 }
  0x93   : > { %v763_v53 = vsub.f32 %v761_v27, %v1511_v20  ;;  %v764_v10 = vmul.f32 %v762_v22, %v762_v22  ;;  %v876_v22 = vsub.s32 1, %v1369_v31 }
  0x94   : > { %v1003_v43 = vrot.slane %v1002_v15, 1 }
  0x95   : > { %v765_v38 = vmul.f32 %v763_v53, %v763_v53 }
  0x96   : > { %v1004_v18 = vadd.f32 %v1003_v43, %v1002_v15  ;;  %v908_v15 = vsub.s32 2, %v1369_v31 }
  0x97   : > { %v766_v19 = vadd.f32 %v765_v38, %v764_v10 }
  0x98   : > { %1009 = vst [vmem:[%s1389_s29 + $0x3] sm:$0x1] %v1004_v18 }
  0x99   : > { %v776_v40 = vsel %vm775_vm7, %v774_v57, %v766_v19 }
  0x9a   : > { %1203 = vrsqrt.f32 %v776_v40  ;;  %vm779_vm8 = vcmp.eq.f32.partialorder %v776_v40, inf  ;;  %v782_v58 = vand.u32 2147483648, %v776_v40  ;;  %vm781_vm9 = vcmp.eq.f32.partialorder %v776_v40, 0.0 }
  0xa4   : > { %v1204_v25 = vpop.eup %1203 }
  0xa5   : > { %v778_v30 = vmul.f32 %v1204_v25, %v776_v40  ;;  %v944_v25 = vunpack.c.l.bf16 %v1402_v50 }
  0xa7   : > { %v780_v11 = vsel %vm779_vm8, %v776_v40, %v778_v30 }
  0xa8   : > { %v783_v20 = vsel %vm781_vm9, %v782_v58, %v780_v11  ;;  %v945_v58 = vunpack.c.l.bf16 %v1404_v51 }
  0xa9   : > { %v785_v45 = vsel %vm784_vm10, %v783_v20, inf }
  0xaa   : > { %v786_v39 = vrot.slane %v785_v45, 4 }
  0xac   : > { %v787_v48 = vmin.f32 %v785_v45, %v786_v39 }
  0xae   : > { %v788_v36 = vrot.slane %v787_v48, 2 }
  0xb0   : > { %v789_v47 = vmin.f32 %v787_v48, %v788_v36 }
  0xb2   : > { %v790_v32 = vrot.slane %v789_v47, 1 }
  0xb4   : > { %v791_v44 = vmin.f32 %v789_v47, %v790_v32 }
  0xb6   : > { %vm792_vm11 = vcmp.eq.f32.partialorder %v783_v20, %v791_v44  ;;  %v813_v38 = vsub.f32 %v783_v20, %v791_v44  ;;  %vm811_vm13 = vcmp.lt.f32.partialorder %v791_v44, 2.0 }
  0xb7   : > { %v793_v63 = vsel %vm792_vm11, %v1378_v33, 6.0  ;;  %vm1613_vm15 = vmand %vm516_vm2, %vm811_vm13 }
  0xb8   : > { %v794_v14 = vsel %vm784_vm10, %v793_v63, inf  ;;  %vm1602_vm14 = vcmp.gt.f32.partialorder %v813_v38, 0.2 }
  0xb9   : > { %v795_v0 = vrot.slane %v794_v14, 4  ;;  %vm817_vm0 = vmand %vm1613_vm15, %vm1602_vm14 }
  0xbb   : > { %v796_v9 = vmin.f32 %v794_v14, %v795_v0 }
  0xbd   : > { %v797_v16 = vrot.slane %v796_v9, 2 }
  0xbf   : > { %v798_v5 = vmin.f32 %v796_v9, %v797_v16 }
  0xc1   : > { %v799_v2 = vrot.slane %v798_v5, 1 }
  0xc3   : > { %v800_v21 = vmin.f32 %v798_v5, %v799_v2 }
  0xc5   : > { %vm801_vm12 = vcmp.eq.f32.partialorder %v1378_v33, %v800_v21 }
  0xc6   : > { %v802_v1 = vsel %vm801_vm12, %v484_v8, 0.0  ;;  %v1157_v52 = vsel %vm801_vm12, 1.0, %v1710_v34 }
  0xc7   : > { %v803_v27 = vsel %vm784_vm10, %v802_v1, 0.0  ;;  %v839_v23 = vpack.c.bf16 %v1157_v52, %v1157_v52 }
  0xc8   : > { %v804_v53 = vrot.slane %v803_v27, 4 }
  0xc9   : > { %v841_v37 = vpack.i.b16 %v839_v23, %v839_v23  ;;  %v855_v10 = vshrl.u32 %v839_v23, 16 }
  0xca   : > { %v805_v43 = vadd.f32 %v804_v53, %v803_v27 }
  0xcb   : > { %v846_v57 = vrot.slane %v841_v37, %v845_v17  ;;  %v856_v18 = vpack.i.b16 %v855_v10, %v855_v10  ;;  %v877_v33 = vrot.slane %v841_v37, %v876_v22  ;;  %v909_v19 = vrot.slane %v841_v37, %v908_v15 }
  0xcc   : > { %v806_v40 = vrot.slane %v805_v43, 2 }
  0xcd   : > { %v1158_v30 = vcombine.low %v846_v57, %v846_v57  ;;  %v861_v11 = vrot.slane %v856_v18, %v845_v17  ;;  %v1160_v45 = vcombine.low %v877_v33, %v877_v33  ;;  %v893_v39 = vrot.slane %v856_v18, %v876_v22  ;;  %v1715_v22 = vld [vmem:[#allocation7_spill] sm:$0xff] }
  0xce   : > { %v807_v48 = vadd.f32 %v806_v40, %v805_v43  ;;  %v1162_v20 = vcombine.low %v909_v19, %v909_v19  ;;  %v925_v63 = vrot.slane %v856_v18, %v908_v15 }
  0xcf   : > { %v851_v36 = vmul.bf16 %v1158_v30, %v1417_v56  ;;  %v852_v47 = vmul.bf16 %v1158_v30, %v1424_v59  ;;  %v853_v32 = vmul.bf16 %v1158_v30, %v1427_v60  ;;  %v854_v0 = vmul.bf16 %v1158_v30, %v1430_v61 }
  0xd0   : > { %v808_v14 = vrot.slane %v807_v48, 1  ;;  %v1159_v9 = vcombine.low %v861_v11, %v861_v11  ;;  %v882_v16 = vmul.bf16 %v1160_v45, %v1469_v26  ;;  %v883_v5 = vmul.bf16 %v1160_v45, %v1472_v35  ;;  %v1716_v11 = vld [vmem:[#allocation8_spill] sm:$0xff] }
  0xd1   : > { %v884_v56 = vmul.bf16 %v1160_v45, %v1475_v42  ;;  %v885_v59 = vmul.bf16 %v1160_v45, %v1478_v46  ;;  %v1161_v60 = vcombine.low %v893_v39, %v893_v39  ;;  %v914_v35 = vmul.bf16 %v1162_v20, %v1514_v28  ;;  %v1717_v39 = vld [vmem:[#allocation9_spill] sm:$0xff] }
  0xd2   : > { %v809_v2 = vadd.f32 %v808_v14, %v807_v48  ;;  %v866_v21 = vmul.bf16 %v1159_v9, %v1449_v6  ;;  %v867_v61 = vmul.bf16 %v1159_v9, %v1452_v7  ;;  %v868_v26 = vmul.bf16 %v1159_v9, %v1455_v12 }
  0xd3   : > { %v869_v49 = vmul.bf16 %v1159_v9, %v1458_v13  ;;  %v898_v1 = vmul.bf16 %v1161_v60, %v1489_v55  ;;  %v899_v52 = vmul.bf16 %v1161_v60, %v1492_v62  ;;  %v900_v12 = vmul.bf16 %v1161_v60, %v1495_v3 }
  0xd4   : > { %v810_v17 = vsub.f32 %v809_v2, %v484_v8  ;;  %v870_v42 = vadd.bf16 %v866_v21, %v851_v36  ;;  %v871_v6 = vadd.bf16 %v867_v61, %v852_v47  ;;  %v872_v46 = vadd.bf16 %v868_v26, %v853_v32  ;;  %v1719_v47 = vld [vmem:[#allocation11_spill] sm:$0xff] }
  0xd5   : > { %v873_v7 = vadd.bf16 %v869_v49, %v854_v0  ;;  %v901_v13 = vmul.bf16 %v1161_v60, %v1498_v4  ;;  %v915_v55 = vmul.bf16 %v1162_v20, %v1517_v29  ;;  %v916_v23 = vmul.bf16 %v1162_v20, %v1521_v41  ;;  %v1720_v0 = vld [vmem:[#allocation5_spill] sm:$0xff] }
  0xd6   : > { %vm818_vm1 = vcmp.lt.f32.partialorder %v810_v17, 0.2  ;;  %v886_v62 = vadd.bf16 %v882_v16, %v870_v42  ;;  %v887_v27 = vadd.bf16 %v883_v5, %v871_v6  ;;  %v888_v28 = vadd.bf16 %v884_v56, %v872_v46  ;;  %v1721_v16 = vld [vmem:[#allocation6_spill] sm:$0xff] }
  0xd7   : > { %vm819_vm2 = vmand %vm817_vm0, %vm818_vm1  ;;  %v889_v8 = vadd.bf16 %v885_v59, %v873_v7  ;;  %v917_v15 = vmul.bf16 %v1162_v20, %v1715_v22  ;;  %v1163_v53 = vcombine.low %v925_v63, %v925_v63  ;;  %v1718_v20 = vld [vmem:[#allocation10_spill] sm:$0xff]  ;;  %v972_v9 = vunpack.c.l.bf16 %v1720_v0 }
  0xd8   : > { %v1156_v37 = vsel %vm819_vm2, 1.0, %v1710_v34  ;;  %v829_v10 = vsel %vm819_vm2, %v810_v17, 0.0  ;;  %v902_v43 = vadd.bf16 %v898_v1, %v886_v62  ;;  %v903_v3 = vadd.bf16 %v899_v52, %v887_v27 }
  0xd9   : > { %v822_v4 = vsel %vm784_vm10, %v1156_v37, 0.0  ;;  %v830_v29 = vsel %vm784_vm10, %v829_v10, 0.0  ;;  %v904_v38 = vadd.bf16 %v900_v12, %v888_v28  ;;  %v905_v57 = vadd.bf16 %v901_v13, %v889_v8 }
  0xda   : > { %v823_v18 = vrot.slane %v822_v4, 4  ;;  %v831_v33 = vrot.slane %v830_v29, 4  ;;  %v918_v19 = vadd.bf16 %v914_v35, %v902_v43  ;;  %v919_v40 = vadd.bf16 %v915_v55, %v903_v3 }
  0xdb   : > { %v920_v30 = vadd.bf16 %v916_v23, %v904_v38  ;;  %v921_v41 = vadd.bf16 %v917_v15, %v905_v57  ;;  %v930_v45 = vmul.bf16 %v1163_v53, %v1716_v11  ;;  %v931_v48 = vmul.bf16 %v1163_v53, %v1717_v39 }
  0xdc   : > { %v824_v34 = vadd.f32 %v823_v18, %v822_v4  ;;  %v832_v31 = vadd.f32 %v831_v33, %v830_v29  ;;  %v932_v36 = vmul.bf16 %v1163_v53, %v1718_v20  ;;  %v933_v32 = vmul.bf16 %v1163_v53, %v1719_v47 }
  0xdd   : > { %v934_v63 = vadd.bf16 %v930_v45, %v918_v19  ;;  %v935_v14 = vadd.bf16 %v931_v48, %v919_v40  ;;  %v973_v44 = vunpack.c.l.bf16 %v1721_v16 }
  0xde   : > { %v825_v5 = vrot.slane %v824_v34, 2  ;;  %v833_v56 = vrot.slane %v832_v31, 2  ;;  %v936_v59 = vadd.bf16 %v932_v36, %v920_v30  ;;  %v937_v60 = vadd.bf16 %v933_v32, %v921_v41 }
  0xdf   : > { %v942_v2 = vunpack.c.l.bf16 %v934_v63  ;;  %v943_v21 = vunpack.c.l.bf16 %v935_v14 }
  0xe0   : > { %v826_v61 = vadd.f32 %v825_v5, %v824_v34  ;;  %v834_v26 = vadd.f32 %v833_v56, %v832_v31  ;;  %v970_v49 = vunpack.c.l.bf16 %v936_v59  ;;  %v971_v1 = vunpack.c.l.bf16 %v937_v60 }
  0xe1   : > { %v946_v52 = vsub.f32 %v942_v2, %v944_v25  ;;  %v947_v35 = vsub.f32 %v943_v21, %v945_v58 }
  0xe2   : > { %v827_v17 = vrot.slane %v826_v61, 1  ;;  %v835_v42 = vrot.slane %v834_v26, 1  ;;  %v974_v6 = vsub.f32 %v970_v49, %v972_v9  ;;  %v975_v46 = vsub.f32 %v971_v1, %v973_v44 }
  0xe3   : > { %v948_v7 = vand.u32 2147483647, %v946_v52  ;;  %v949_v12 = vand.u32 2147483647, %v947_v35  ;;  %v952_v13 = vmul.f32 0.5, %v946_v52  ;;  %v953_v55 = vmul.f32 0.5, %v947_v35 }
  0xe4   : > { %v828_v62 = vadd.f32 %v827_v17, %v826_v61  ;;  %v836_v27 = vadd.f32 %v835_v42, %v834_v26  ;;  %v976_v28 = vand.u32 2147483647, %v974_v6  ;;  %v977_v8 = vand.u32 2147483647, %v975_v46 }
  0xe5   : > { %vm1649_vm3 = vcmp.lt.f32.partialorder %v948_v7, 1.0  ;;  %vm1653_vm4 = vcmp.lt.f32.partialorder %v949_v12, 1.0  ;;  %v954_v25 = vmul.f32 %v952_v13, %v946_v52  ;;  %v955_v58 = vmul.f32 %v953_v55, %v947_v35 }
  0xe6   : > { %v1164_v23 = vadd.f32 -0.5, %v948_v7  ;;  %v1165_v22 = vadd.f32 -0.5, %v949_v12  ;;  %1006 = vst [vmem:[%s1389_s29] sm:$0x1] %v828_v62  ;;  %1007 = vst [vmem:[%s1389_s29 + $0x1] sm:$0x1] %v836_v27  ;;  %v980_v15 = vmul.f32 0.5, %v974_v6 }
  0xe7   : > { %v981_v53 = vmul.f32 0.5, %v975_v46  ;;  %v1166_v37 = vadd.f32 -0.5, %v976_v28  ;;  %v1167_v10 = vadd.f32 -0.5, %v977_v8  ;;  %vm978_vm7 = vcmp.lt.f32.partialorder %v976_v28, 1.0 }
  0xe8   : > { %v958_v43 = vsel %vm1649_vm3, %v954_v25, %v1164_v23  ;;  %v959_v3 = vsel %vm1653_vm4, %v955_v58, %v1165_v22  ;;  %vm979_vm8 = vcmp.lt.f32.partialorder %v977_v8, 1.0  ;;  %v982_v38 = vmul.f32 %v980_v15, %v974_v6 }
  0xe9   : > { %v960_v4 = vsel %vm940_vm5, %v958_v43, 0.0  ;;  %v961_v29 = vsel %vm941_vm6, %v959_v3, 0.0  ;;  %v983_v57 = vmul.f32 %v981_v53, %v975_v46 }
  0xea   : > { %v962_v18 = vadd.f32 %v961_v29, %v960_v4  ;;  %v986_v33 = vsel %vm978_vm7, %v982_v38, %v1166_v37 }
  0xeb   : > { %v987_v19 = vsel %vm979_vm8, %v983_v57, %v1167_v10  ;;  %v988_v30 = vsel %vm940_vm5, %v986_v33, 0.0 }
  0xec   : > { %v963_v40 = vrot.slane %v962_v18, 4  ;;  %v989_v41 = vsel %vm941_vm6, %v987_v19, 0.0 }
  0xed   : > { %v990_v11 = vadd.f32 %v989_v41, %v988_v30 }
  0xee   : > { %v964_v45 = vadd.f32 %v963_v40, %v962_v18 }
  0xef   : > { %v991_v39 = vrot.slane %v990_v11, 4 }
  0xf0   : > { %v965_v48 = vrot.slane %v964_v45, 2 }
  0xf1   : > { %v992_v34 = vadd.f32 %v991_v39, %v990_v11 }
  0xf2   : > { %v966_v31 = vadd.f32 %v965_v48, %v964_v45 }
  0xf3   : > { %v993_v20 = vrot.slane %v992_v34, 2 }
  0xf4   : > { %v967_v36 = vrot.slane %v966_v31, 1 }
  0xf5   : > { %v994_v47 = vadd.f32 %v993_v20, %v992_v34 }
  0xf6   : > { %v968_v32 = vadd.f32 %v967_v36, %v966_v31 }
  0xf7   : > { %v995_v63 = vrot.slane %v994_v47, 1 }
  0xf9   : > { %v996_v14 = vadd.f32 %v995_v63, %v994_v47 }
  0xfb   : > { %v997_v0 = vadd.f32 %v996_v14, %v968_v32 }
  0xfd   : > { %1008 = vst [vmem:[%s1389_s29 + $0x2] sm:$0x1] %v997_v0 }
  0xfe PF: > { %p11_p9 = scmp.ge.s32.totalorder %s1272_s19, 4   ;;  %s1726_s15 = smov %s1223_s16 }
  0xff   : > { %s1727_s16 = smov %s1281_s22  ;;  %s1728_s17 = smov %s1272_s19 }
 0x100   :  { %13 = sbr.rel (!%p11_p9) target bundleno = 2 (0x2), region = 218 }

</bundles_post_ra>
